<compile_context>
chip_gen: v5e
topology: v5e:2x2
jax: 0.10.0
libtpu: 0.0.40
codegen_flags: <defaults>
</compile_context>

<pallas_src>
import functools
import math

import jax
import jax.numpy as jnp
from jax.experimental import pallas as pl
from jax.experimental.pallas import tpu as pltpu

# ----------------------------- config ---------------------------------------
HIDDEN = 32
NUM_HEADS = 4
HEAD_DIM = HIDDEN // NUM_HEADS
INTERMEDIATE = 64
NUM_LAYERS = 2
VOCAB = 128
MAX_POS = 16
NUM_TYPES = 2
LN_EPS = 1e-12  # BERT uses 1e-12


# ----------------------------- in-kernel helpers ------------------------------
def _layernorm(x, gamma, beta, eps):
    mean = jnp.mean(x, axis=-1, keepdims=True)
    var = jnp.mean((x - mean) ** 2, axis=-1, keepdims=True)
    return (x - mean) * jax.lax.rsqrt(var + eps) * gamma + beta


def _gelu(x):
    # TODO(synk): reference BERT uses the exact erf-based GELU; tanh approximation
    # is used here for guaranteed Mosaic lowering (differs at ~1e-3 level).
    return 0.5 * x * (1.0 + jnp.tanh(0.7978845608028654 * (x + 0.044715 * x * x * x)))


# ----------------------------- fused encoder-stack kernel ---------------------
def _encoder_stack_kernel(
    emb_ref, mask_ref, eg_ref, ebias_ref,
    qkvw_ref, qkvb_ref, ow_ref, ob_ref, l1g_ref, l1b_ref,
    iw_ref, ib_ref, dw_ref, db_ref, l2g_ref, l2b_ref,
    out_ref,
    qkv_sc, attn_sc, x_sc,
    *, B, S, nH, D, scale, eps,
):
    """One grid step == one full encoder layer; activations carried in x_sc."""
    H = nH * D
    layer = pl.program_id(0)

    # Embedding LayerNorm, fused into the first layer step.
    @pl.when(layer == 0)
    def _():
        x_sc[...] = _layernorm(emb_ref[...], eg_ref[...], ebias_ref[...], eps)

    x = x_sc[...]                                   # (B*S, H)
    mask = mask_ref[...]                            # (B, S) additive mask

    # ---- fused Q/K/V projection: one MXU pass on a (H, 3H) weight ----
    qkv_sc[...] = (
        jnp.dot(x, qkvw_ref[0], preferred_element_type=jnp.float32) + qkvb_ref[0]
    )

    # ---- multi-head self-attention, all (batch, head) pairs in-kernel ----
    # Output projection is folded per head:  ctx @ Wo == sum_h ctx_h @ Wo[h*D:(h+1)*D, :]
    for b in range(B):
        row_mask = mask[b:b + 1, :]                 # (1, S) broadcast over query rows
        acc = jnp.zeros((S, H), jnp.float32)
        for h in range(nH):
            r0, r1 = b * S, (b + 1) * S
            q_bh = qkv_sc[r0:r1, h * D:(h + 1) * D]                    # (S, D)
            k_bh = qkv_sc[r0:r1, H + h * D:H + (h + 1) * D]            # (S, D)
            v_bh = qkv_sc[r0:r1, 2 * H + h * D:2 * H + (h + 1) * D]    # (S, D)
            s = jnp.dot(q_bh, k_bh.T, preferred_element_type=jnp.float32) * scale
            s = s + row_mask
            s = s - jnp.max(s, axis=-1, keepdims=True)
            p = jnp.exp(s)
            p = p * pl.reciprocal(jnp.sum(p, axis=-1, keepdims=True), approx=True)
            ctx_bh = jnp.dot(p, v_bh, preferred_element_type=jnp.float32)  # (S, D)
            acc = acc + jnp.dot(
                ctx_bh, ow_ref[0, h * D:(h + 1) * D, :],
                preferred_element_type=jnp.float32,
            )
        attn_sc[b * S:(b + 1) * S, :] = acc

    attn_out = attn_sc[...] + ob_ref[0]
    x = _layernorm(x + attn_out, l1g_ref[0], l1b_ref[0], eps)   # residual + LN1 fused

    # ---- feed-forward + residual + LN2, fused ----
    inter = jnp.dot(x, iw_ref[0], preferred_element_type=jnp.float32) + ib_ref[0]
    inter = _gelu(inter)
    ffn = jnp.dot(inter, dw_ref[0], preferred_element_type=jnp.float32) + db_ref[0]
    x = _layernorm(x + ffn, l2g_ref[0], l2b_ref[0], eps)

    x_sc[...] = x

    @pl.when(layer == pl.num_programs(0) - 1)
    def _():
        out_ref[...] = x


def encoder_stack(emb2d, add_mask, p):
    """emb2d: (B*S, H) pre-LN embeddings; add_mask: (B, S) additive mask."""
    M, H = emb2d.shape
    B, S = add_mask.shape
    L = p["qkv_w"].shape[0]

    def rep(a):  # whole array, replicated across grid steps
        nd = a.ndim
        return pl.BlockSpec(a.shape, lambda l, _nd=nd: (0,) * _nd)

    def per_layer(a):  # slice one layer's weights per grid step
        return pl.BlockSpec((1,) + a.shape[1:], lambda l: (l, 0, 0))

    kernel = functools.partial(
        _encoder_stack_kernel,
        B=B, S=S, nH=NUM_HEADS, D=HEAD_DIM,
        scale=1.0 / math.sqrt(HEAD_DIM), eps=LN_EPS,
    )

    return pl.pallas_call(
        kernel,
        out_shape=jax.ShapeDtypeStruct((M, H), jnp.float32),
        grid=(L,),
        in_specs=[
            rep(emb2d), rep(add_mask), rep(p["emb_ln_g"]), rep(p["emb_ln_b"]),
            per_layer(p["qkv_w"]), per_layer(p["qkv_b"]),
            per_layer(p["o_w"]), per_layer(p["o_b"]),
            per_layer(p["ln1_g"]), per_layer(p["ln1_b"]),
            per_layer(p["i_w"]), per_layer(p["i_b"]),
            per_layer(p["d_w"]), per_layer(p["d_b"]),
            per_layer(p["ln2_g"]), per_layer(p["ln2_b"]),
        ],
        out_specs=pl.BlockSpec((M, H), lambda l: (0, 0)),
        scratch_shapes=[
            pltpu.VMEM((M, 3 * H), jnp.float32),   # fused QKV activations
            pltpu.VMEM((M, H), jnp.float32),       # attention output accumulator
            pltpu.VMEM((M, H), jnp.float32),       # carried activation x
        ],
        compiler_params=pltpu.CompilerParams(
            dimension_semantics=("arbitrary",),    # layer axis is sequentially dependent
        ),
    )(
        emb2d, add_mask, p["emb_ln_g"], p["emb_ln_b"],
        p["qkv_w"], p["qkv_b"], p["o_w"], p["o_b"],
        p["ln1_g"], p["ln1_b"], p["i_w"], p["i_b"],
        p["d_w"], p["d_b"], p["ln2_g"], p["ln2_b"],
    )


# ----------------------------- parameters -----------------------------------
def init_params(key):
    keys = iter(jax.random.split(key, 64))

    def nrm(shape):
        return 0.02 * jax.random.normal(next(keys), shape, dtype=jnp.float32)

    params = {
        "word_emb": nrm((VOCAB, HIDDEN)),
        "pos_emb": nrm((MAX_POS, HIDDEN)),
        "type_emb": nrm((NUM_TYPES, HIDDEN)),
        "emb_ln_g": jnp.ones((1, HIDDEN), jnp.float32),
        "emb_ln_b": jnp.zeros((1, HIDDEN), jnp.float32),
        "pool_w": nrm((HIDDEN, HIDDEN)),
        "pool_b": jnp.zeros((HIDDEN,), jnp.float32),
        # per-layer weights, stacked along a leading layer axis (streamed via BlockSpec)
        "qkv_w": nrm((NUM_LAYERS, HIDDEN, 3 * HIDDEN)),
        "qkv_b": jnp.zeros((NUM_LAYERS, 1, 3 * HIDDEN), jnp.float32),
        "o_w": nrm((NUM_LAYERS, HIDDEN, HIDDEN)),
        "o_b": jnp.zeros((NUM_LAYERS, 1, HIDDEN), jnp.float32),
        "ln1_g": jnp.ones((NUM_LAYERS, 1, HIDDEN), jnp.float32),
        "ln1_b": jnp.zeros((NUM_LAYERS, 1, HIDDEN), jnp.float32),
        "i_w": nrm((NUM_LAYERS, HIDDEN, INTERMEDIATE)),
        "i_b": jnp.zeros((NUM_LAYERS, 1, INTERMEDIATE), jnp.float32),
        "d_w": nrm((NUM_LAYERS, INTERMEDIATE, HIDDEN)),
        "d_b": jnp.zeros((NUM_LAYERS, 1, HIDDEN), jnp.float32),
        "ln2_g": jnp.ones((NUM_LAYERS, 1, HIDDEN), jnp.float32),
        "ln2_b": jnp.zeros((NUM_LAYERS, 1, HIDDEN), jnp.float32),
    }
    return params


# ----------------------------- model ----------------------------------------
def bert_forward(params, encoder_batch, encoder_padding_mask):
    """encoder_batch: (B, S) int32 token ids; encoder_padding_mask: (B, S) {0,1}."""
    B, S = encoder_batch.shape

    # Embedding gathers are glue; kept in plain JAX.
    word = params["word_emb"][encoder_batch]                      # (B, S, H)
    pos = params["pos_emb"][jnp.arange(S)][None, :, :]            # (1, S, H)
    tok = params["type_emb"][jnp.zeros((B, S), jnp.int32)]        # (B, S, H)
    emb = (word + pos + tok).reshape(B * S, HIDDEN)

    # BERT-style additive attention mask: (1 - mask) * -10000, shape (B, S).
    add_mask = (1.0 - encoder_padding_mask.astype(jnp.float32)) * -10000.0

    seq = encoder_stack(emb, add_mask, params)                    # (B*S, H) — one pallas_call
    sequence_output = seq.reshape(B, S, HIDDEN)

    # Pooler: tiny (B,H)x(H,H) matmul — plain JAX (own pallas_call would be pure launch overhead).
    cls = sequence_output[:, 0, :]                                # (B, H)
    pooled_output = jnp.tanh(cls @ params["pool_w"] + params["pool_b"])
    return sequence_output, pooled_output


# ----------------------------- main ------------------------------------------
if __name__ == "__main__":
    B, S = 2, 8
    params = init_params(jax.random.PRNGKey(0))

    ids_key, _ = jax.random.split(jax.random.PRNGKey(0))
    encoder_batch = jax.random.randint(ids_key, (B, S), 0, VOCAB, dtype=jnp.int32)
    encoder_padding_mask = jnp.ones((B, S), dtype=jnp.int32)
    encoder_padding_mask = encoder_padding_mask.at[1, 6:].set(0)  # pad tail of sample 1

    fwd = jax.jit(bert_forward)
    sequence_output, pooled_output = fwd(params, encoder_batch, encoder_padding_mask)
    jax.block_until_ready((sequence_output, pooled_output))

    assert sequence_output.shape == (B, S, HIDDEN)
    assert pooled_output.shape == (B, HIDDEN)
    print("KERNEL_OK")
</pallas_src>

<mosaic_0001>
module attributes {stable_mosaic.version = 11 : i64} {
  func.func @_encoder_stack_kernel(%arg0: i32, %arg1: memref<16x32xf32, #tpu.memory_space<vmem>>, %arg2: memref<2x8xf32, #tpu.memory_space<vmem>>, %arg3: memref<1x32xf32, #tpu.memory_space<vmem>>, %arg4: memref<1x32xf32, #tpu.memory_space<vmem>>, %arg5: memref<1x32x96xf32, #tpu.memory_space<vmem>>, %arg6: memref<1x1x96xf32, #tpu.memory_space<vmem>>, %arg7: memref<1x32x32xf32, #tpu.memory_space<vmem>>, %arg8: memref<1x1x32xf32, #tpu.memory_space<vmem>>, %arg9: memref<1x1x32xf32, #tpu.memory_space<vmem>>, %arg10: memref<1x1x32xf32, #tpu.memory_space<vmem>>, %arg11: memref<1x32x64xf32, #tpu.memory_space<vmem>>, %arg12: memref<1x1x64xf32, #tpu.memory_space<vmem>>, %arg13: memref<1x64x32xf32, #tpu.memory_space<vmem>>, %arg14: memref<1x1x32xf32, #tpu.memory_space<vmem>>, %arg15: memref<1x1x32xf32, #tpu.memory_space<vmem>>, %arg16: memref<1x1x32xf32, #tpu.memory_space<vmem>>, %arg17: memref<16x32xf32, #tpu.memory_space<vmem>>, %arg18: memref<16x96xf32, #tpu.memory_space<vmem>>, %arg19: memref<16x32xf32, #tpu.memory_space<vmem>>, %arg20: memref<16x32xf32, #tpu.memory_space<vmem>>) attributes {dimension_semantics = [#tpu.dimension_semantics<arbitrary>], iteration_bounds = array<i64: 2>, scalar_prefetch = 0 : i64, scratch_operands = 3 : i64, tpu.core_type = #tpu.core_type<tc>, window_params = [{pipeline_mode = #tpu.pipeline_mode<synchronous>, transform_indices = @transform_0, window_bounds = array<i64: 16, 32>}, {pipeline_mode = #tpu.pipeline_mode<synchronous>, transform_indices = @transform_1, window_bounds = array<i64: 2, 8>}, {pipeline_mode = #tpu.pipeline_mode<synchronous>, transform_indices = @transform_2, window_bounds = array<i64: 1, 32>}, {pipeline_mode = #tpu.pipeline_mode<synchronous>, transform_indices = @transform_3, window_bounds = array<i64: 1, 32>}, {transform_indices = @transform_4, window_bounds = array<i64: 1, 32, 96>}, {transform_indices = @transform_5, window_bounds = array<i64: 1, 1, 96>}, {transform_indices = @transform_6, window_bounds = array<i64: 1, 32, 32>}, {transform_indices = @transform_7, window_bounds = array<i64: 1, 1, 32>}, {transform_indices = @transform_8, window_bounds = array<i64: 1, 1, 32>}, {transform_indices = @transform_9, window_bounds = array<i64: 1, 1, 32>}, {transform_indices = @transform_10, window_bounds = array<i64: 1, 32, 64>}, {transform_indices = @transform_11, window_bounds = array<i64: 1, 1, 64>}, {transform_indices = @transform_12, window_bounds = array<i64: 1, 64, 32>}, {transform_indices = @transform_13, window_bounds = array<i64: 1, 1, 32>}, {transform_indices = @transform_14, window_bounds = array<i64: 1, 1, 32>}, {transform_indices = @transform_15, window_bounds = array<i64: 1, 1, 32>}, {pipeline_mode = #tpu.pipeline_mode<synchronous>, transform_indices = @transform_16, window_bounds = array<i64: 16, 32>}]} {
    %c0_i32 = arith.constant 0 : i32
    %0 = arith.cmpi eq, %arg0, %c0_i32 : i32
    %1 = arith.extui %0 : i1 to i32
    %c0_i32_0 = arith.constant 0 : i32
    %2 = arith.cmpi ne, %1, %c0_i32_0 : i32
    scf.if %2 {
      %c0_175 = arith.constant 0 : index
      %c0_176 = arith.constant 0 : index
      %301 = vector.load %arg1[%c0_175, %c0_176] : memref<16x32xf32, #tpu.memory_space<vmem>>, vector<16x32xf32>
      %c0_177 = arith.constant 0 : index
      %c0_178 = arith.constant 0 : index
      %302 = vector.load %arg3[%c0_177, %c0_178] : memref<1x32xf32, #tpu.memory_space<vmem>>, vector<1x32xf32>
      %c0_179 = arith.constant 0 : index
      %c0_180 = arith.constant 0 : index
      %303 = vector.load %arg4[%c0_179, %c0_180] : memref<1x32xf32, #tpu.memory_space<vmem>>, vector<1x32xf32>
      %cst_181 = arith.constant dense<0.000000e+00> : vector<16xf32>
      %304 = vector.multi_reduction <add>, %301, %cst_181 [1] : vector<16x32xf32> to vector<16xf32>
      %305 = vector.shape_cast %304 : vector<16xf32> to vector<16x1xf32>
      %cst_182 = arith.constant 3.200000e+01 : f32
      %306 = vector.broadcast %cst_182 : f32 to vector<16x1xf32>
      %307 = arith.divf %305, %306 : vector<16x1xf32>
      %308 = vector.broadcast %307 : vector<16x1xf32> to vector<16x32xf32>
      %309 = arith.subf %301, %308 : vector<16x32xf32>
      %310 = arith.mulf %309, %309 : vector<16x32xf32>
      %cst_183 = arith.constant dense<0.000000e+00> : vector<16xf32>
      %311 = vector.multi_reduction <add>, %310, %cst_183 [1] : vector<16x32xf32> to vector<16xf32>
      %312 = vector.shape_cast %311 : vector<16xf32> to vector<16x1xf32>
      %cst_184 = arith.constant 3.200000e+01 : f32
      %313 = vector.broadcast %cst_184 : f32 to vector<16x1xf32>
      %314 = arith.divf %312, %313 : vector<16x1xf32>
      %315 = vector.broadcast %307 : vector<16x1xf32> to vector<16x32xf32>
      %316 = arith.subf %301, %315 : vector<16x32xf32>
      %cst_185 = arith.constant 9.99999996E-13 : f32
      %317 = vector.broadcast %cst_185 : f32 to vector<16x1xf32>
      %318 = arith.addf %314, %317 : vector<16x1xf32>
      %319 = math.rsqrt %318 : vector<16x1xf32>
      %320 = vector.broadcast %319 : vector<16x1xf32> to vector<16x32xf32>
      %321 = arith.mulf %316, %320 : vector<16x32xf32>
      %322 = vector.broadcast %302 : vector<1x32xf32> to vector<16x32xf32>
      %323 = arith.mulf %321, %322 : vector<16x32xf32>
      %324 = vector.broadcast %303 : vector<1x32xf32> to vector<16x32xf32>
      %325 = arith.addf %323, %324 : vector<16x32xf32>
      %c0_186 = arith.constant 0 : index
      %c0_187 = arith.constant 0 : index
      %326 = vector.load %arg20[%c0_186, %c0_187] : memref<16x32xf32, #tpu.memory_space<vmem>>, vector<16x32xf32>
      tpu.vector_store %arg20[%c0_186, %c0_187], %325 {strides = array<i32>} : memref<16x32xf32, #tpu.memory_space<vmem>>, vector<16x32xf32>,
    } else {
    }
    %c0 = arith.constant 0 : index
    %c0_1 = arith.constant 0 : index
    %3 = vector.load %arg20[%c0, %c0_1] : memref<16x32xf32, #tpu.memory_space<vmem>>, vector<16x32xf32>
    %c0_2 = arith.constant 0 : index
    %c0_3 = arith.constant 0 : index
    %4 = vector.load %arg2[%c0_2, %c0_3] : memref<2x8xf32, #tpu.memory_space<vmem>>, vector<2x8xf32>
    %c0_4 = arith.constant 0 : index
    %c0_5 = arith.constant 0 : index
    %c0_6 = arith.constant 0 : index
    %5 = vector.load %arg5[%c0_4, %c0_5, %c0_6] : memref<1x32x96xf32, #tpu.memory_space<vmem>>, vector<1x32x96xf32>
    %6 = vector.shape_cast %5 : vector<1x32x96xf32> to vector<32x96xf32>
    %cst = arith.constant dense<0.000000e+00> : vector<16x96xf32>
    %7 = tpu.matmul %3, %6, %cst {dimension_numbers = #tpu.dot_dimension_numbers<[1], [0], [0], [1], [0, 0, 1, 1], [], []>} : vector<16x32xf32>, vector<32x96xf32>, vector<16x96xf32> -> vector<16x96xf32>
    %c0_7 = arith.constant 0 : index
    %c0_8 = arith.constant 0 : index
    %c0_9 = arith.constant 0 : index
    %8 = vector.load %arg6[%c0_7, %c0_8, %c0_9] : memref<1x1x96xf32, #tpu.memory_space<vmem>>, vector<1x1x96xf32>
    %9 = vector.shape_cast %8 : vector<1x1x96xf32> to vector<1x96xf32>
    %10 = vector.broadcast %9 : vector<1x96xf32> to vector<16x96xf32>
    %11 = arith.addf %7, %10 : vector<16x96xf32>
    %c0_10 = arith.constant 0 : index
    %c0_11 = arith.constant 0 : index
    %12 = vector.load %arg18[%c0_10, %c0_11] : memref<16x96xf32, #tpu.memory_space<vmem>>, vector<16x96xf32>
    tpu.vector_store %arg18[%c0_10, %c0_11], %11 {strides = array<i32>} : memref<16x96xf32, #tpu.memory_space<vmem>>, vector<16x96xf32>,
    %13 = vector.extract_strided_slice %4 {offsets = [0, 0], sizes = [1, 8], strides = [1, 1]} : vector<2x8xf32> to vector<1x8xf32>
    %cst_12 = arith.constant 0.000000e+00 : f32
    %14 = vector.broadcast %cst_12 : f32 to vector<8x32xf32>
    %c0_13 = arith.constant 0 : index
    %c0_14 = arith.constant 0 : index
    %15 = vector.load %arg18[%c0_13, %c0_14] : memref<16x96xf32, #tpu.memory_space<vmem>>, vector<8x8xf32>
    %c0_15 = arith.constant 0 : index
    %c32 = arith.constant 32 : index
    %16 = vector.load %arg18[%c0_15, %c32] : memref<16x96xf32, #tpu.memory_space<vmem>>, vector<8x8xf32>
    %c0_16 = arith.constant 0 : index
    %c64 = arith.constant 64 : index
    %17 = vector.load %arg18[%c0_16, %c64] : memref<16x96xf32, #tpu.memory_space<vmem>>, vector<8x8xf32>
    %18 = tpu.transpose %16, [1, 0] : vector<8x8xf32> -> vector<8x8xf32>
    %cst_17 = arith.constant dense<0.000000e+00> : vector<8x8xf32>
    %19 = tpu.matmul %15, %18, %cst_17 {dimension_numbers = #tpu.dot_dimension_numbers<[1], [0], [0], [1], [0, 0, 1, 1], [], []>} : vector<8x8xf32>, vector<8x8xf32>, vector<8x8xf32> -> vector<8x8xf32>
    %cst_18 = arith.constant 0.353553385 : f32
    %20 = vector.broadcast %cst_18 : f32 to vector<8x8xf32>
    %21 = arith.mulf %19, %20 : vector<8x8xf32>
    %22 = vector.broadcast %13 : vector<1x8xf32> to vector<8x8xf32>
    %23 = arith.addf %21, %22 : vector<8x8xf32>
    %cst_19 = arith.constant dense<0xFF800000> : vector<8xf32>
    %24 = vector.multi_reduction <maximumf>, %23, %cst_19 [1] : vector<8x8xf32> to vector<8xf32>
    %25 = vector.shape_cast %24 : vector<8xf32> to vector<8x1xf32>
    %26 = vector.broadcast %25 : vector<8x1xf32> to vector<8x8xf32>
    %27 = arith.subf %23, %26 : vector<8x8xf32>
    %28 = math.exp %27 : vector<8x8xf32>
    %cst_20 = arith.constant dense<0.000000e+00> : vector<8xf32>
    %29 = vector.multi_reduction <add>, %28, %cst_20 [1] : vector<8x8xf32> to vector<8xf32>
    %30 = vector.shape_cast %29 : vector<8xf32> to vector<8x1xf32>
    %31 = tpu.reciprocal %30 {approx = true} : vector<8x1xf32> -> vector<8x1xf32>
    %32 = vector.broadcast %31 : vector<8x1xf32> to vector<8x8xf32>
    %33 = arith.mulf %28, %32 : vector<8x8xf32>
    %cst_21 = arith.constant dense<0.000000e+00> : vector<8x8xf32>
    %34 = tpu.matmul %33, %17, %cst_21 {dimension_numbers = #tpu.dot_dimension_numbers<[1], [0], [0], [1], [0, 0, 1, 1], [], []>} : vector<8x8xf32>, vector<8x8xf32>, vector<8x8xf32> -> vector<8x8xf32>
    %c0_22 = arith.constant 0 : index
    %c0_23 = arith.constant 0 : index
    %c0_24 = arith.constant 0 : index
    %35 = vector.load %arg7[%c0_22, %c0_23, %c0_24] : memref<1x32x32xf32, #tpu.memory_space<vmem>>, vector<1x8x32xf32>
    %36 = vector.shape_cast %35 : vector<1x8x32xf32> to vector<8x32xf32>
    %cst_25 = arith.constant dense<0.000000e+00> : vector<8x32xf32>
    %37 = tpu.matmul %34, %36, %cst_25 {dimension_numbers = #tpu.dot_dimension_numbers<[1], [0], [0], [1], [0, 0, 1, 1], [], []>} : vector<8x8xf32>, vector<8x32xf32>, vector<8x32xf32> -> vector<8x32xf32>
    %38 = arith.addf %14, %37 : vector<8x32xf32>
    %c0_26 = arith.constant 0 : index
    %c8 = arith.constant 8 : index
    %39 = vector.load %arg18[%c0_26, %c8] : memref<16x96xf32, #tpu.memory_space<vmem>>, vector<8x8xf32>
    %c0_27 = arith.constant 0 : index
    %c40 = arith.constant 40 : index
    %40 = vector.load %arg18[%c0_27, %c40] : memref<16x96xf32, #tpu.memory_space<vmem>>, vector<8x8xf32>
    %c0_28 = arith.constant 0 : index
    %c72 = arith.constant 72 : index
    %41 = vector.load %arg18[%c0_28, %c72] : memref<16x96xf32, #tpu.memory_space<vmem>>, vector<8x8xf32>
    %42 = tpu.transpose %40, [1, 0] : vector<8x8xf32> -> vector<8x8xf32>
    %cst_29 = arith.constant dense<0.000000e+00> : vector<8x8xf32>
    %43 = tpu.matmul %39, %42, %cst_29 {dimension_numbers = #tpu.dot_dimension_numbers<[1], [0], [0], [1], [0, 0, 1, 1], [], []>} : vector<8x8xf32>, vector<8x8xf32>, vector<8x8xf32> -> vector<8x8xf32>
    %cst_30 = arith.constant 0.353553385 : f32
    %44 = vector.broadcast %cst_30 : f32 to vector<8x8xf32>
    %45 = arith.mulf %43, %44 : vector<8x8xf32>
    %46 = vector.broadcast %13 : vector<1x8xf32> to vector<8x8xf32>
    %47 = arith.addf %45, %46 : vector<8x8xf32>
    %cst_31 = arith.constant dense<0xFF800000> : vector<8xf32>
    %48 = vector.multi_reduction <maximumf>, %47, %cst_31 [1] : vector<8x8xf32> to vector<8xf32>
    %49 = vector.shape_cast %48 : vector<8xf32> to vector<8x1xf32>
    %50 = vector.broadcast %49 : vector<8x1xf32> to vector<8x8xf32>
    %51 = arith.subf %47, %50 : vector<8x8xf32>
    %52 = math.exp %51 : vector<8x8xf32>
    %cst_32 = arith.constant dense<0.000000e+00> : vector<8xf32>
    %53 = vector.multi_reduction <add>, %52, %cst_32 [1] : vector<8x8xf32> to vector<8xf32>
    %54 = vector.shape_cast %53 : vector<8xf32> to vector<8x1xf32>
    %55 = tpu.reciprocal %54 {approx = true} : vector<8x1xf32> -> vector<8x1xf32>
    %56 = vector.broadcast %55 : vector<8x1xf32> to vector<8x8xf32>
    %57 = arith.mulf %52, %56 : vector<8x8xf32>
    %cst_33 = arith.constant dense<0.000000e+00> : vector<8x8xf32>
    %58 = tpu.matmul %57, %41, %cst_33 {dimension_numbers = #tpu.dot_dimension_numbers<[1], [0], [0], [1], [0, 0, 1, 1], [], []>} : vector<8x8xf32>, vector<8x8xf32>, vector<8x8xf32> -> vector<8x8xf32>
    %c0_34 = arith.constant 0 : index
    %c8_35 = arith.constant 8 : index
    %c0_36 = arith.constant 0 : index
    %59 = vector.load %arg7[%c0_34, %c8_35, %c0_36] : memref<1x32x32xf32, #tpu.memory_space<vmem>>, vector<1x8x32xf32>
    %60 = vector.shape_cast %59 : vector<1x8x32xf32> to vector<8x32xf32>
    %cst_37 = arith.constant dense<0.000000e+00> : vector<8x32xf32>
    %61 = tpu.matmul %58, %60, %cst_37 {dimension_numbers = #tpu.dot_dimension_numbers<[1], [0], [0], [1], [0, 0, 1, 1], [], []>} : vector<8x8xf32>, vector<8x32xf32>, vector<8x32xf32> -> vector<8x32xf32>
    %62 = arith.addf %38, %61 : vector<8x32xf32>
    %c0_38 = arith.constant 0 : index
    %c16 = arith.constant 16 : index
    %63 = vector.load %arg18[%c0_38, %c16] : memref<16x96xf32, #tpu.memory_space<vmem>>, vector<8x8xf32>
    %c0_39 = arith.constant 0 : index
    %c48 = arith.constant 48 : index
    %64 = vector.load %arg18[%c0_39, %c48] : memref<16x96xf32, #tpu.memory_space<vmem>>, vector<8x8xf32>
    %c0_40 = arith.constant 0 : index
    %c80 = arith.constant 80 : index
    %65 = vector.load %arg18[%c0_40, %c80] : memref<16x96xf32, #tpu.memory_space<vmem>>, vector<8x8xf32>
    %66 = tpu.transpose %64, [1, 0] : vector<8x8xf32> -> vector<8x8xf32>
    %cst_41 = arith.constant dense<0.000000e+00> : vector<8x8xf32>
    %67 = tpu.matmul %63, %66, %cst_41 {dimension_numbers = #tpu.dot_dimension_numbers<[1], [0], [0], [1], [0, 0, 1, 1], [], []>} : vector<8x8xf32>, vector<8x8xf32>, vector<8x8xf32> -> vector<8x8xf32>
    %cst_42 = arith.constant 0.353553385 : f32
    %68 = vector.broadcast %cst_42 : f32 to vector<8x8xf32>
    %69 = arith.mulf %67, %68 : vector<8x8xf32>
    %70 = vector.broadcast %13 : vector<1x8xf32> to vector<8x8xf32>
    %71 = arith.addf %69, %70 : vector<8x8xf32>
    %cst_43 = arith.constant dense<0xFF800000> : vector<8xf32>
    %72 = vector.multi_reduction <maximumf>, %71, %cst_43 [1] : vector<8x8xf32> to vector<8xf32>
    %73 = vector.shape_cast %72 : vector<8xf32> to vector<8x1xf32>
    %74 = vector.broadcast %73 : vector<8x1xf32> to vector<8x8xf32>
    %75 = arith.subf %71, %74 : vector<8x8xf32>
    %76 = math.exp %75 : vector<8x8xf32>
    %cst_44 = arith.constant dense<0.000000e+00> : vector<8xf32>
    %77 = vector.multi_reduction <add>, %76, %cst_44 [1] : vector<8x8xf32> to vector<8xf32>
    %78 = vector.shape_cast %77 : vector<8xf32> to vector<8x1xf32>
    %79 = tpu.reciprocal %78 {approx = true} : vector<8x1xf32> -> vector<8x1xf32>
    %80 = vector.broadcast %79 : vector<8x1xf32> to vector<8x8xf32>
    %81 = arith.mulf %76, %80 : vector<8x8xf32>
    %cst_45 = arith.constant dense<0.000000e+00> : vector<8x8xf32>
    %82 = tpu.matmul %81, %65, %cst_45 {dimension_numbers = #tpu.dot_dimension_numbers<[1], [0], [0], [1], [0, 0, 1, 1], [], []>} : vector<8x8xf32>, vector<8x8xf32>, vector<8x8xf32> -> vector<8x8xf32>
    %c0_46 = arith.constant 0 : index
    %c16_47 = arith.constant 16 : index
    %c0_48 = arith.constant 0 : index
    %83 = vector.load %arg7[%c0_46, %c16_47, %c0_48] : memref<1x32x32xf32, #tpu.memory_space<vmem>>, vector<1x8x32xf32>
    %84 = vector.shape_cast %83 : vector<1x8x32xf32> to vector<8x32xf32>
    %cst_49 = arith.constant dense<0.000000e+00> : vector<8x32xf32>
    %85 = tpu.matmul %82, %84, %cst_49 {dimension_numbers = #tpu.dot_dimension_numbers<[1], [0], [0], [1], [0, 0, 1, 1], [], []>} : vector<8x8xf32>, vector<8x32xf32>, vector<8x32xf32> -> vector<8x32xf32>
    %86 = arith.addf %62, %85 : vector<8x32xf32>
    %c0_50 = arith.constant 0 : index
    %c24 = arith.constant 24 : index
    %87 = vector.load %arg18[%c0_50, %c24] : memref<16x96xf32, #tpu.memory_space<vmem>>, vector<8x8xf32>
    %c0_51 = arith.constant 0 : index
    %c56 = arith.constant 56 : index
    %88 = vector.load %arg18[%c0_51, %c56] : memref<16x96xf32, #tpu.memory_space<vmem>>, vector<8x8xf32>
    %c0_52 = arith.constant 0 : index
    %c88 = arith.constant 88 : index
    %89 = vector.load %arg18[%c0_52, %c88] : memref<16x96xf32, #tpu.memory_space<vmem>>, vector<8x8xf32>
    %90 = tpu.transpose %88, [1, 0] : vector<8x8xf32> -> vector<8x8xf32>
    %cst_53 = arith.constant dense<0.000000e+00> : vector<8x8xf32>
    %91 = tpu.matmul %87, %90, %cst_53 {dimension_numbers = #tpu.dot_dimension_numbers<[1], [0], [0], [1], [0, 0, 1, 1], [], []>} : vector<8x8xf32>, vector<8x8xf32>, vector<8x8xf32> -> vector<8x8xf32>
    %cst_54 = arith.constant 0.353553385 : f32
    %92 = vector.broadcast %cst_54 : f32 to vector<8x8xf32>
    %93 = arith.mulf %91, %92 : vector<8x8xf32>
    %94 = vector.broadcast %13 : vector<1x8xf32> to vector<8x8xf32>
    %95 = arith.addf %93, %94 : vector<8x8xf32>
    %cst_55 = arith.constant dense<0xFF800000> : vector<8xf32>
    %96 = vector.multi_reduction <maximumf>, %95, %cst_55 [1] : vector<8x8xf32> to vector<8xf32>
    %97 = vector.shape_cast %96 : vector<8xf32> to vector<8x1xf32>
    %98 = vector.broadcast %97 : vector<8x1xf32> to vector<8x8xf32>
    %99 = arith.subf %95, %98 : vector<8x8xf32>
    %100 = math.exp %99 : vector<8x8xf32>
    %cst_56 = arith.constant dense<0.000000e+00> : vector<8xf32>
    %101 = vector.multi_reduction <add>, %100, %cst_56 [1] : vector<8x8xf32> to vector<8xf32>
    %102 = vector.shape_cast %101 : vector<8xf32> to vector<8x1xf32>
    %103 = tpu.reciprocal %102 {approx = true} : vector<8x1xf32> -> vector<8x1xf32>
    %104 = vector.broadcast %103 : vector<8x1xf32> to vector<8x8xf32>
    %105 = arith.mulf %100, %104 : vector<8x8xf32>
    %cst_57 = arith.constant dense<0.000000e+00> : vector<8x8xf32>
    %106 = tpu.matmul %105, %89, %cst_57 {dimension_numbers = #tpu.dot_dimension_numbers<[1], [0], [0], [1], [0, 0, 1, 1], [], []>} : vector<8x8xf32>, vector<8x8xf32>, vector<8x8xf32> -> vector<8x8xf32>
    %c0_58 = arith.constant 0 : index
    %c24_59 = arith.constant 24 : index
    %c0_60 = arith.constant 0 : index
    %107 = vector.load %arg7[%c0_58, %c24_59, %c0_60] : memref<1x32x32xf32, #tpu.memory_space<vmem>>, vector<1x8x32xf32>
    %108 = vector.shape_cast %107 : vector<1x8x32xf32> to vector<8x32xf32>
    %cst_61 = arith.constant dense<0.000000e+00> : vector<8x32xf32>
    %109 = tpu.matmul %106, %108, %cst_61 {dimension_numbers = #tpu.dot_dimension_numbers<[1], [0], [0], [1], [0, 0, 1, 1], [], []>} : vector<8x8xf32>, vector<8x32xf32>, vector<8x32xf32> -> vector<8x32xf32>
    %110 = arith.addf %86, %109 : vector<8x32xf32>
    %c0_62 = arith.constant 0 : index
    %c0_63 = arith.constant 0 : index
    %111 = vector.load %arg19[%c0_62, %c0_63] : memref<16x32xf32, #tpu.memory_space<vmem>>, vector<8x32xf32>
    tpu.vector_store %arg19[%c0_62, %c0_63], %110 {strides = array<i32>} : memref<16x32xf32, #tpu.memory_space<vmem>>, vector<8x32xf32>,
    %112 = vector.extract_strided_slice %4 {offsets = [1, 0], sizes = [1, 8], strides = [1, 1]} : vector<2x8xf32> to vector<1x8xf32>
    %cst_64 = arith.constant 0.000000e+00 : f32
    %113 = vector.broadcast %cst_64 : f32 to vector<8x32xf32>
    %c8_65 = arith.constant 8 : index
    %c0_66 = arith.constant 0 : index
    %114 = vector.load %arg18[%c8_65, %c0_66] : memref<16x96xf32, #tpu.memory_space<vmem>>, vector<8x8xf32>
    %c8_67 = arith.constant 8 : index
    %c32_68 = arith.constant 32 : index
    %115 = vector.load %arg18[%c8_67, %c32_68] : memref<16x96xf32, #tpu.memory_space<vmem>>, vector<8x8xf32>
    %c8_69 = arith.constant 8 : index
    %c64_70 = arith.constant 64 : index
    %116 = vector.load %arg18[%c8_69, %c64_70] : memref<16x96xf32, #tpu.memory_space<vmem>>, vector<8x8xf32>
    %117 = tpu.transpose %115, [1, 0] : vector<8x8xf32> -> vector<8x8xf32>
    %cst_71 = arith.constant dense<0.000000e+00> : vector<8x8xf32>
    %118 = tpu.matmul %114, %117, %cst_71 {dimension_numbers = #tpu.dot_dimension_numbers<[1], [0], [0], [1], [0, 0, 1, 1], [], []>} : vector<8x8xf32>, vector<8x8xf32>, vector<8x8xf32> -> vector<8x8xf32>
    %cst_72 = arith.constant 0.353553385 : f32
    %119 = vector.broadcast %cst_72 : f32 to vector<8x8xf32>
    %120 = arith.mulf %118, %119 : vector<8x8xf32>
    %121 = vector.broadcast %112 : vector<1x8xf32> to vector<8x8xf32>
    %122 = arith.addf %120, %121 : vector<8x8xf32>
    %cst_73 = arith.constant dense<0xFF800000> : vector<8xf32>
    %123 = vector.multi_reduction <maximumf>, %122, %cst_73 [1] : vector<8x8xf32> to vector<8xf32>
    %124 = vector.shape_cast %123 : vector<8xf32> to vector<8x1xf32>
    %125 = vector.broadcast %124 : vector<8x1xf32> to vector<8x8xf32>
    %126 = arith.subf %122, %125 : vector<8x8xf32>
    %127 = math.exp %126 : vector<8x8xf32>
    %cst_74 = arith.constant dense<0.000000e+00> : vector<8xf32>
    %128 = vector.multi_reduction <add>, %127, %cst_74 [1] : vector<8x8xf32> to vector<8xf32>
    %129 = vector.shape_cast %128 : vector<8xf32> to vector<8x1xf32>
    %130 = tpu.reciprocal %129 {approx = true} : vector<8x1xf32> -> vector<8x1xf32>
    %131 = vector.broadcast %130 : vector<8x1xf32> to vector<8x8xf32>
    %132 = arith.mulf %127, %131 : vector<8x8xf32>
    %cst_75 = arith.constant dense<0.000000e+00> : vector<8x8xf32>
    %133 = tpu.matmul %132, %116, %cst_75 {dimension_numbers = #tpu.dot_dimension_numbers<[1], [0], [0], [1], [0, 0, 1, 1], [], []>} : vector<8x8xf32>, vector<8x8xf32>, vector<8x8xf32> -> vector<8x8xf32>
    %c0_76 = arith.constant 0 : index
    %c0_77 = arith.constant 0 : index
    %c0_78 = arith.constant 0 : index
    %134 = vector.load %arg7[%c0_76, %c0_77, %c0_78] : memref<1x32x32xf32, #tpu.memory_space<vmem>>, vector<1x8x32xf32>
    %135 = vector.shape_cast %134 : vector<1x8x32xf32> to vector<8x32xf32>
    %cst_79 = arith.constant dense<0.000000e+00> : vector<8x32xf32>
    %136 = tpu.matmul %133, %135, %cst_79 {dimension_numbers = #tpu.dot_dimension_numbers<[1], [0], [0], [1], [0, 0, 1, 1], [], []>} : vector<8x8xf32>, vector<8x32xf32>, vector<8x32xf32> -> vector<8x32xf32>
    %137 = arith.addf %113, %136 : vector<8x32xf32>
    %c8_80 = arith.constant 8 : index
    %c8_81 = arith.constant 8 : index
    %138 = vector.load %arg18[%c8_80, %c8_81] : memref<16x96xf32, #tpu.memory_space<vmem>>, vector<8x8xf32>
    %c8_82 = arith.constant 8 : index
    %c40_83 = arith.constant 40 : index
    %139 = vector.load %arg18[%c8_82, %c40_83] : memref<16x96xf32, #tpu.memory_space<vmem>>, vector<8x8xf32>
    %c8_84 = arith.constant 8 : index
    %c72_85 = arith.constant 72 : index
    %140 = vector.load %arg18[%c8_84, %c72_85] : memref<16x96xf32, #tpu.memory_space<vmem>>, vector<8x8xf32>
    %141 = tpu.transpose %139, [1, 0] : vector<8x8xf32> -> vector<8x8xf32>
    %cst_86 = arith.constant dense<0.000000e+00> : vector<8x8xf32>
    %142 = tpu.matmul %138, %141, %cst_86 {dimension_numbers = #tpu.dot_dimension_numbers<[1], [0], [0], [1], [0, 0, 1, 1], [], []>} : vector<8x8xf32>, vector<8x8xf32>, vector<8x8xf32> -> vector<8x8xf32>
    %cst_87 = arith.constant 0.353553385 : f32
    %143 = vector.broadcast %cst_87 : f32 to vector<8x8xf32>
    %144 = arith.mulf %142, %143 : vector<8x8xf32>
    %145 = vector.broadcast %112 : vector<1x8xf32> to vector<8x8xf32>
    %146 = arith.addf %144, %145 : vector<8x8xf32>
    %cst_88 = arith.constant dense<0xFF800000> : vector<8xf32>
    %147 = vector.multi_reduction <maximumf>, %146, %cst_88 [1] : vector<8x8xf32> to vector<8xf32>
    %148 = vector.shape_cast %147 : vector<8xf32> to vector<8x1xf32>
    %149 = vector.broadcast %148 : vector<8x1xf32> to vector<8x8xf32>
    %150 = arith.subf %146, %149 : vector<8x8xf32>
    %151 = math.exp %150 : vector<8x8xf32>
    %cst_89 = arith.constant dense<0.000000e+00> : vector<8xf32>
    %152 = vector.multi_reduction <add>, %151, %cst_89 [1] : vector<8x8xf32> to vector<8xf32>
    %153 = vector.shape_cast %152 : vector<8xf32> to vector<8x1xf32>
    %154 = tpu.reciprocal %153 {approx = true} : vector<8x1xf32> -> vector<8x1xf32>
    %155 = vector.broadcast %154 : vector<8x1xf32> to vector<8x8xf32>
    %156 = arith.mulf %151, %155 : vector<8x8xf32>
    %cst_90 = arith.constant dense<0.000000e+00> : vector<8x8xf32>
    %157 = tpu.matmul %156, %140, %cst_90 {dimension_numbers = #tpu.dot_dimension_numbers<[1], [0], [0], [1], [0, 0, 1, 1], [], []>} : vector<8x8xf32>, vector<8x8xf32>, vector<8x8xf32> -> vector<8x8xf32>
    %c0_91 = arith.constant 0 : index
    %c8_92 = arith.constant 8 : index
    %c0_93 = arith.constant 0 : index
    %158 = vector.load %arg7[%c0_91, %c8_92, %c0_93] : memref<1x32x32xf32, #tpu.memory_space<vmem>>, vector<1x8x32xf32>
    %159 = vector.shape_cast %158 : vector<1x8x32xf32> to vector<8x32xf32>
    %cst_94 = arith.constant dense<0.000000e+00> : vector<8x32xf32>
    %160 = tpu.matmul %157, %159, %cst_94 {dimension_numbers = #tpu.dot_dimension_numbers<[1], [0], [0], [1], [0, 0, 1, 1], [], []>} : vector<8x8xf32>, vector<8x32xf32>, vector<8x32xf32> -> vector<8x32xf32>
    %161 = arith.addf %137, %160 : vector<8x32xf32>
    %c8_95 = arith.constant 8 : index
    %c16_96 = arith.constant 16 : index
    %162 = vector.load %arg18[%c8_95, %c16_96] : memref<16x96xf32, #tpu.memory_space<vmem>>, vector<8x8xf32>
    %c8_97 = arith.constant 8 : index
    %c48_98 = arith.constant 48 : index
    %163 = vector.load %arg18[%c8_97, %c48_98] : memref<16x96xf32, #tpu.memory_space<vmem>>, vector<8x8xf32>
    %c8_99 = arith.constant 8 : index
    %c80_100 = arith.constant 80 : index
    %164 = vector.load %arg18[%c8_99, %c80_100] : memref<16x96xf32, #tpu.memory_space<vmem>>, vector<8x8xf32>
    %165 = tpu.transpose %163, [1, 0] : vector<8x8xf32> -> vector<8x8xf32>
    %cst_101 = arith.constant dense<0.000000e+00> : vector<8x8xf32>
    %166 = tpu.matmul %162, %165, %cst_101 {dimension_numbers = #tpu.dot_dimension_numbers<[1], [0], [0], [1], [0, 0, 1, 1], [], []>} : vector<8x8xf32>, vector<8x8xf32>, vector<8x8xf32> -> vector<8x8xf32>
    %cst_102 = arith.constant 0.353553385 : f32
    %167 = vector.broadcast %cst_102 : f32 to vector<8x8xf32>
    %168 = arith.mulf %166, %167 : vector<8x8xf32>
    %169 = vector.broadcast %112 : vector<1x8xf32> to vector<8x8xf32>
    %170 = arith.addf %168, %169 : vector<8x8xf32>
    %cst_103 = arith.constant dense<0xFF800000> : vector<8xf32>
    %171 = vector.multi_reduction <maximumf>, %170, %cst_103 [1] : vector<8x8xf32> to vector<8xf32>
    %172 = vector.shape_cast %171 : vector<8xf32> to vector<8x1xf32>
    %173 = vector.broadcast %172 : vector<8x1xf32> to vector<8x8xf32>
    %174 = arith.subf %170, %173 : vector<8x8xf32>
    %175 = math.exp %174 : vector<8x8xf32>
    %cst_104 = arith.constant dense<0.000000e+00> : vector<8xf32>
    %176 = vector.multi_reduction <add>, %175, %cst_104 [1] : vector<8x8xf32> to vector<8xf32>
    %177 = vector.shape_cast %176 : vector<8xf32> to vector<8x1xf32>
    %178 = tpu.reciprocal %177 {approx = true} : vector<8x1xf32> -> vector<8x1xf32>
    %179 = vector.broadcast %178 : vector<8x1xf32> to vector<8x8xf32>
    %180 = arith.mulf %175, %179 : vector<8x8xf32>
    %cst_105 = arith.constant dense<0.000000e+00> : vector<8x8xf32>
    %181 = tpu.matmul %180, %164, %cst_105 {dimension_numbers = #tpu.dot_dimension_numbers<[1], [0], [0], [1], [0, 0, 1, 1], [], []>} : vector<8x8xf32>, vector<8x8xf32>, vector<8x8xf32> -> vector<8x8xf32>
    %c0_106 = arith.constant 0 : index
    %c16_107 = arith.constant 16 : index
    %c0_108 = arith.constant 0 : index
    %182 = vector.load %arg7[%c0_106, %c16_107, %c0_108] : memref<1x32x32xf32, #tpu.memory_space<vmem>>, vector<1x8x32xf32>
    %183 = vector.shape_cast %182 : vector<1x8x32xf32> to vector<8x32xf32>
    %cst_109 = arith.constant dense<0.000000e+00> : vector<8x32xf32>
    %184 = tpu.matmul %181, %183, %cst_109 {dimension_numbers = #tpu.dot_dimension_numbers<[1], [0], [0], [1], [0, 0, 1, 1], [], []>} : vector<8x8xf32>, vector<8x32xf32>, vector<8x32xf32> -> vector<8x32xf32>
    %185 = arith.addf %161, %184 : vector<8x32xf32>
    %c8_110 = arith.constant 8 : index
    %c24_111 = arith.constant 24 : index
    %186 = vector.load %arg18[%c8_110, %c24_111] : memref<16x96xf32, #tpu.memory_space<vmem>>, vector<8x8xf32>
    %c8_112 = arith.constant 8 : index
    %c56_113 = arith.constant 56 : index
    %187 = vector.load %arg18[%c8_112, %c56_113] : memref<16x96xf32, #tpu.memory_space<vmem>>, vector<8x8xf32>
    %c8_114 = arith.constant 8 : index
    %c88_115 = arith.constant 88 : index
    %188 = vector.load %arg18[%c8_114, %c88_115] : memref<16x96xf32, #tpu.memory_space<vmem>>, vector<8x8xf32>
    %189 = tpu.transpose %187, [1, 0] : vector<8x8xf32> -> vector<8x8xf32>
    %cst_116 = arith.constant dense<0.000000e+00> : vector<8x8xf32>
    %190 = tpu.matmul %186, %189, %cst_116 {dimension_numbers = #tpu.dot_dimension_numbers<[1], [0], [0], [1], [0, 0, 1, 1], [], []>} : vector<8x8xf32>, vector<8x8xf32>, vector<8x8xf32> -> vector<8x8xf32>
    %cst_117 = arith.constant 0.353553385 : f32
    %191 = vector.broadcast %cst_117 : f32 to vector<8x8xf32>
    %192 = arith.mulf %190, %191 : vector<8x8xf32>
    %193 = vector.broadcast %112 : vector<1x8xf32> to vector<8x8xf32>
    %194 = arith.addf %192, %193 : vector<8x8xf32>
    %cst_118 = arith.constant dense<0xFF800000> : vector<8xf32>
    %195 = vector.multi_reduction <maximumf>, %194, %cst_118 [1] : vector<8x8xf32> to vector<8xf32>
    %196 = vector.shape_cast %195 : vector<8xf32> to vector<8x1xf32>
    %197 = vector.broadcast %196 : vector<8x1xf32> to vector<8x8xf32>
    %198 = arith.subf %194, %197 : vector<8x8xf32>
    %199 = math.exp %198 : vector<8x8xf32>
    %cst_119 = arith.constant dense<0.000000e+00> : vector<8xf32>
    %200 = vector.multi_reduction <add>, %199, %cst_119 [1] : vector<8x8xf32> to vector<8xf32>
    %201 = vector.shape_cast %200 : vector<8xf32> to vector<8x1xf32>
    %202 = tpu.reciprocal %201 {approx = true} : vector<8x1xf32> -> vector<8x1xf32>
    %203 = vector.broadcast %202 : vector<8x1xf32> to vector<8x8xf32>
    %204 = arith.mulf %199, %203 : vector<8x8xf32>
    %cst_120 = arith.constant dense<0.000000e+00> : vector<8x8xf32>
    %205 = tpu.matmul %204, %188, %cst_120 {dimension_numbers = #tpu.dot_dimension_numbers<[1], [0], [0], [1], [0, 0, 1, 1], [], []>} : vector<8x8xf32>, vector<8x8xf32>, vector<8x8xf32> -> vector<8x8xf32>
    %c0_121 = arith.constant 0 : index
    %c24_122 = arith.constant 24 : index
    %c0_123 = arith.constant 0 : index
    %206 = vector.load %arg7[%c0_121, %c24_122, %c0_123] : memref<1x32x32xf32, #tpu.memory_space<vmem>>, vector<1x8x32xf32>
    %207 = vector.shape_cast %206 : vector<1x8x32xf32> to vector<8x32xf32>
    %cst_124 = arith.constant dense<0.000000e+00> : vector<8x32xf32>
    %208 = tpu.matmul %205, %207, %cst_124 {dimension_numbers = #tpu.dot_dimension_numbers<[1], [0], [0], [1], [0, 0, 1, 1], [], []>} : vector<8x8xf32>, vector<8x32xf32>, vector<8x32xf32> -> vector<8x32xf32>
    %209 = arith.addf %185, %208 : vector<8x32xf32>
    %c8_125 = arith.constant 8 : index
    %c0_126 = arith.constant 0 : index
    %210 = vector.load %arg19[%c8_125, %c0_126] : memref<16x32xf32, #tpu.memory_space<vmem>>, vector<8x32xf32>
    tpu.vector_store %arg19[%c8_125, %c0_126], %209 {strides = array<i32>} : memref<16x32xf32, #tpu.memory_space<vmem>>, vector<8x32xf32>,
    %c0_127 = arith.constant 0 : index
    %c0_128 = arith.constant 0 : index
    %211 = vector.load %arg19[%c0_127, %c0_128] : memref<16x32xf32, #tpu.memory_space<vmem>>, vector<16x32xf32>
    %c0_129 = arith.constant 0 : index
    %c0_130 = arith.constant 0 : index
    %c0_131 = arith.constant 0 : index
    %212 = vector.load %arg8[%c0_129, %c0_130, %c0_131] : memref<1x1x32xf32, #tpu.memory_space<vmem>>, vector<1x1x32xf32>
    %213 = vector.shape_cast %212 : vector<1x1x32xf32> to vector<1x32xf32>
    %214 = vector.broadcast %213 : vector<1x32xf32> to vector<16x32xf32>
    %215 = arith.addf %211, %214 : vector<16x32xf32>
    %216 = arith.addf %3, %215 : vector<16x32xf32>
    %c0_132 = arith.constant 0 : index
    %c0_133 = arith.constant 0 : index
    %c0_134 = arith.constant 0 : index
    %217 = vector.load %arg9[%c0_132, %c0_133, %c0_134] : memref<1x1x32xf32, #tpu.memory_space<vmem>>, vector<1x1x32xf32>
    %218 = vector.shape_cast %217 : vector<1x1x32xf32> to vector<1x32xf32>
    %c0_135 = arith.constant 0 : index
    %c0_136 = arith.constant 0 : index
    %c0_137 = arith.constant 0 : index
    %219 = vector.load %arg10[%c0_135, %c0_136, %c0_137] : memref<1x1x32xf32, #tpu.memory_space<vmem>>, vector<1x1x32xf32>
    %220 = vector.shape_cast %219 : vector<1x1x32xf32> to vector<1x32xf32>
    %cst_138 = arith.constant dense<0.000000e+00> : vector<16xf32>
    %221 = vector.multi_reduction <add>, %216, %cst_138 [1] : vector<16x32xf32> to vector<16xf32>
    %222 = vector.shape_cast %221 : vector<16xf32> to vector<16x1xf32>
    %cst_139 = arith.constant 3.200000e+01 : f32
    %223 = vector.broadcast %cst_139 : f32 to vector<16x1xf32>
    %224 = arith.divf %222, %223 : vector<16x1xf32>
    %225 = vector.broadcast %224 : vector<16x1xf32> to vector<16x32xf32>
    %226 = arith.subf %216, %225 : vector<16x32xf32>
    %227 = arith.mulf %226, %226 : vector<16x32xf32>
    %cst_140 = arith.constant dense<0.000000e+00> : vector<16xf32>
    %228 = vector.multi_reduction <add>, %227, %cst_140 [1] : vector<16x32xf32> to vector<16xf32>
    %229 = vector.shape_cast %228 : vector<16xf32> to vector<16x1xf32>
    %cst_141 = arith.constant 3.200000e+01 : f32
    %230 = vector.broadcast %cst_141 : f32 to vector<16x1xf32>
    %231 = arith.divf %229, %230 : vector<16x1xf32>
    %232 = vector.broadcast %224 : vector<16x1xf32> to vector<16x32xf32>
    %233 = arith.subf %216, %232 : vector<16x32xf32>
    %cst_142 = arith.constant 9.99999996E-13 : f32
    %234 = vector.broadcast %cst_142 : f32 to vector<16x1xf32>
    %235 = arith.addf %231, %234 : vector<16x1xf32>
    %236 = math.rsqrt %235 : vector<16x1xf32>
    %237 = vector.broadcast %236 : vector<16x1xf32> to vector<16x32xf32>
    %238 = arith.mulf %233, %237 : vector<16x32xf32>
    %239 = vector.broadcast %218 : vector<1x32xf32> to vector<16x32xf32>
    %240 = arith.mulf %238, %239 : vector<16x32xf32>
    %241 = vector.broadcast %220 : vector<1x32xf32> to vector<16x32xf32>
    %242 = arith.addf %240, %241 : vector<16x32xf32>
    %c0_143 = arith.constant 0 : index
    %c0_144 = arith.constant 0 : index
    %c0_145 = arith.constant 0 : index
    %243 = vector.load %arg11[%c0_143, %c0_144, %c0_145] : memref<1x32x64xf32, #tpu.memory_space<vmem>>, vector<1x32x64xf32>
    %244 = vector.shape_cast %243 : vector<1x32x64xf32> to vector<32x64xf32>
    %cst_146 = arith.constant dense<0.000000e+00> : vector<16x64xf32>
    %245 = tpu.matmul %242, %244, %cst_146 {dimension_numbers = #tpu.dot_dimension_numbers<[1], [0], [0], [1], [0, 0, 1, 1], [], []>} : vector<16x32xf32>, vector<32x64xf32>, vector<16x64xf32> -> vector<16x64xf32>
    %c0_147 = arith.constant 0 : index
    %c0_148 = arith.constant 0 : index
    %c0_149 = arith.constant 0 : index
    %246 = vector.load %arg12[%c0_147, %c0_148, %c0_149] : memref<1x1x64xf32, #tpu.memory_space<vmem>>, vector<1x1x64xf32>
    %247 = vector.shape_cast %246 : vector<1x1x64xf32> to vector<1x64xf32>
    %248 = vector.broadcast %247 : vector<1x64xf32> to vector<16x64xf32>
    %249 = arith.addf %245, %248 : vector<16x64xf32>
    %cst_150 = arith.constant 5.000000e-01 : f32
    %250 = vector.broadcast %cst_150 : f32 to vector<16x64xf32>
    %251 = arith.mulf %250, %249 : vector<16x64xf32>
    %cst_151 = arith.constant 4.471500e-02 : f32
    %252 = vector.broadcast %cst_151 : f32 to vector<16x64xf32>
    %253 = arith.mulf %252, %249 : vector<16x64xf32>
    %254 = arith.mulf %253, %249 : vector<16x64xf32>
    %255 = arith.mulf %254, %249 : vector<16x64xf32>
    %256 = arith.addf %249, %255 : vector<16x64xf32>
    %cst_152 = arith.constant 0.797884583 : f32
    %257 = vector.broadcast %cst_152 : f32 to vector<16x64xf32>
    %258 = arith.mulf %257, %256 : vector<16x64xf32>
    %259 = math.tanh %258 : vector<16x64xf32>
    %cst_153 = arith.constant 1.000000e+00 : f32
    %260 = vector.broadcast %cst_153 : f32 to vector<16x64xf32>
    %261 = arith.addf %260, %259 : vector<16x64xf32>
    %262 = arith.mulf %251, %261 : vector<16x64xf32>
    %c0_154 = arith.constant 0 : index
    %c0_155 = arith.constant 0 : index
    %c0_156 = arith.constant 0 : index
    %263 = vector.load %arg13[%c0_154, %c0_155, %c0_156] : memref<1x64x32xf32, #tpu.memory_space<vmem>>, vector<1x64x32xf32>
    %264 = vector.shape_cast %263 : vector<1x64x32xf32> to vector<64x32xf32>
    %cst_157 = arith.constant dense<0.000000e+00> : vector<16x32xf32>
    %265 = tpu.matmul %262, %264, %cst_157 {dimension_numbers = #tpu.dot_dimension_numbers<[1], [0], [0], [1], [0, 0, 1, 1], [], []>} : vector<16x64xf32>, vector<64x32xf32>, vector<16x32xf32> -> vector<16x32xf32>
    %c0_158 = arith.constant 0 : index
    %c0_159 = arith.constant 0 : index
    %c0_160 = arith.constant 0 : index
    %266 = vector.load %arg14[%c0_158, %c0_159, %c0_160] : memref<1x1x32xf32, #tpu.memory_space<vmem>>, vector<1x1x32xf32>
    %267 = vector.shape_cast %266 : vector<1x1x32xf32> to vector<1x32xf32>
    %268 = vector.broadcast %267 : vector<1x32xf32> to vector<16x32xf32>
    %269 = arith.addf %265, %268 : vector<16x32xf32>
    %270 = arith.addf %242, %269 : vector<16x32xf32>
    %c0_161 = arith.constant 0 : index
    %c0_162 = arith.constant 0 : index
    %c0_163 = arith.constant 0 : index
    %271 = vector.load %arg15[%c0_161, %c0_162, %c0_163] : memref<1x1x32xf32, #tpu.memory_space<vmem>>, vector<1x1x32xf32>
    %272 = vector.shape_cast %271 : vector<1x1x32xf32> to vector<1x32xf32>
    %c0_164 = arith.constant 0 : index
    %c0_165 = arith.constant 0 : index
    %c0_166 = arith.constant 0 : index
    %273 = vector.load %arg16[%c0_164, %c0_165, %c0_166] : memref<1x1x32xf32, #tpu.memory_space<vmem>>, vector<1x1x32xf32>
    %274 = vector.shape_cast %273 : vector<1x1x32xf32> to vector<1x32xf32>
    %cst_167 = arith.constant dense<0.000000e+00> : vector<16xf32>
    %275 = vector.multi_reduction <add>, %270, %cst_167 [1] : vector<16x32xf32> to vector<16xf32>
    %276 = vector.shape_cast %275 : vector<16xf32> to vector<16x1xf32>
    %cst_168 = arith.constant 3.200000e+01 : f32
    %277 = vector.broadcast %cst_168 : f32 to vector<16x1xf32>
    %278 = arith.divf %276, %277 : vector<16x1xf32>
    %279 = vector.broadcast %278 : vector<16x1xf32> to vector<16x32xf32>
    %280 = arith.subf %270, %279 : vector<16x32xf32>
    %281 = arith.mulf %280, %280 : vector<16x32xf32>
    %cst_169 = arith.constant dense<0.000000e+00> : vector<16xf32>
    %282 = vector.multi_reduction <add>, %281, %cst_169 [1] : vector<16x32xf32> to vector<16xf32>
    %283 = vector.shape_cast %282 : vector<16xf32> to vector<16x1xf32>
    %cst_170 = arith.constant 3.200000e+01 : f32
    %284 = vector.broadcast %cst_170 : f32 to vector<16x1xf32>
    %285 = arith.divf %283, %284 : vector<16x1xf32>
    %286 = vector.broadcast %278 : vector<16x1xf32> to vector<16x32xf32>
    %287 = arith.subf %270, %286 : vector<16x32xf32>
    %cst_171 = arith.constant 9.99999996E-13 : f32
    %288 = vector.broadcast %cst_171 : f32 to vector<16x1xf32>
    %289 = arith.addf %285, %288 : vector<16x1xf32>
    %290 = math.rsqrt %289 : vector<16x1xf32>
    %291 = vector.broadcast %290 : vector<16x1xf32> to vector<16x32xf32>
    %292 = arith.mulf %287, %291 : vector<16x32xf32>
    %293 = vector.broadcast %272 : vector<1x32xf32> to vector<16x32xf32>
    %294 = arith.mulf %292, %293 : vector<16x32xf32>
    %295 = vector.broadcast %274 : vector<1x32xf32> to vector<16x32xf32>
    %296 = arith.addf %294, %295 : vector<16x32xf32>
    %c0_172 = arith.constant 0 : index
    %c0_173 = arith.constant 0 : index
    %297 = vector.load %arg20[%c0_172, %c0_173] : memref<16x32xf32, #tpu.memory_space<vmem>>, vector<16x32xf32>
    tpu.vector_store %arg20[%c0_172, %c0_173], %296 {strides = array<i32>} : memref<16x32xf32, #tpu.memory_space<vmem>>, vector<16x32xf32>,
    %c1_i32 = arith.constant 1 : i32
    %298 = arith.cmpi eq, %arg0, %c1_i32 : i32
    %299 = arith.extui %298 : i1 to i32
    %c0_i32_174 = arith.constant 0 : i32
    %300 = arith.cmpi ne, %299, %c0_i32_174 : i32
    scf.if %300 {
      %c0_175 = arith.constant 0 : index
      %c0_176 = arith.constant 0 : index
      %301 = vector.load %arg17[%c0_175, %c0_176] : memref<16x32xf32, #tpu.memory_space<vmem>>, vector<16x32xf32>
      tpu.vector_store %arg17[%c0_175, %c0_176], %296 {strides = array<i32>} : memref<16x32xf32, #tpu.memory_space<vmem>>, vector<16x32xf32>,
    } else {
    }
    return
  }
  func.func @transform_0(%arg0: i32) -> (i32, i32) {
    %c0_i32 = arith.constant 0 : i32
    %c0_i32_0 = arith.constant 0 : i32
    %c0_i32_1 = arith.constant 0 : i32
    return %c0_i32, %c0_i32_0 : i32, i32
  }
  func.func @transform_1(%arg0: i32) -> (i32, i32) {
    %c0_i32 = arith.constant 0 : i32
    %c0_i32_0 = arith.constant 0 : i32
    %c0_i32_1 = arith.constant 0 : i32
    return %c0_i32, %c0_i32_0 : i32, i32
  }
  func.func @transform_2(%arg0: i32) -> (i32, i32) {
    %c0_i32 = arith.constant 0 : i32
    %c0_i32_0 = arith.constant 0 : i32
    %c0_i32_1 = arith.constant 0 : i32
    return %c0_i32, %c0_i32_0 : i32, i32
  }
  func.func @transform_3(%arg0: i32) -> (i32, i32) {
    %c0_i32 = arith.constant 0 : i32
    %c0_i32_0 = arith.constant 0 : i32
    %c0_i32_1 = arith.constant 0 : i32
    return %c0_i32, %c0_i32_0 : i32, i32
  }
  func.func @transform_4(%arg0: i32) -> (i32, i32, i32) {
    %c0_i32 = arith.constant 0 : i32
    %c0_i32_0 = arith.constant 0 : i32
    %c0_i32_1 = arith.constant 0 : i32
    return %arg0, %c0_i32, %c0_i32_0 : i32, i32, i32
  }
  func.func @transform_5(%arg0: i32) -> (i32, i32, i32) {
    %c0_i32 = arith.constant 0 : i32
    %c0_i32_0 = arith.constant 0 : i32
    %c0_i32_1 = arith.constant 0 : i32
    return %arg0, %c0_i32, %c0_i32_0 : i32, i32, i32
  }
  func.func @transform_6(%arg0: i32) -> (i32, i32, i32) {
    %c0_i32 = arith.constant 0 : i32
    %c0_i32_0 = arith.constant 0 : i32
    %c0_i32_1 = arith.constant 0 : i32
    return %arg0, %c0_i32, %c0_i32_0 : i32, i32, i32
  }
  func.func @transform_7(%arg0: i32) -> (i32, i32, i32) {
    %c0_i32 = arith.constant 0 : i32
    %c0_i32_0 = arith.constant 0 : i32
    %c0_i32_1 = arith.constant 0 : i32
    return %arg0, %c0_i32, %c0_i32_0 : i32, i32, i32
  }
  func.func @transform_8(%arg0: i32) -> (i32, i32, i32) {
    %c0_i32 = arith.constant 0 : i32
    %c0_i32_0 = arith.constant 0 : i32
    %c0_i32_1 = arith.constant 0 : i32
    return %arg0, %c0_i32, %c0_i32_0 : i32, i32, i32
  }
  func.func @transform_9(%arg0: i32) -> (i32, i32, i32) {
    %c0_i32 = arith.constant 0 : i32
    %c0_i32_0 = arith.constant 0 : i32
    %c0_i32_1 = arith.constant 0 : i32
    return %arg0, %c0_i32, %c0_i32_0 : i32, i32, i32
  }
  func.func @transform_10(%arg0: i32) -> (i32, i32, i32) {
    %c0_i32 = arith.constant 0 : i32
    %c0_i32_0 = arith.constant 0 : i32
    %c0_i32_1 = arith.constant 0 : i32
    return %arg0, %c0_i32, %c0_i32_0 : i32, i32, i32
  }
  func.func @transform_11(%arg0: i32) -> (i32, i32, i32) {
    %c0_i32 = arith.constant 0 : i32
    %c0_i32_0 = arith.constant 0 : i32
    %c0_i32_1 = arith.constant 0 : i32
    return %arg0, %c0_i32, %c0_i32_0 : i32, i32, i32
  }
  func.func @transform_12(%arg0: i32) -> (i32, i32, i32) {
    %c0_i32 = arith.constant 0 : i32
    %c0_i32_0 = arith.constant 0 : i32
    %c0_i32_1 = arith.constant 0 : i32
    return %arg0, %c0_i32, %c0_i32_0 : i32, i32, i32
  }
  func.func @transform_13(%arg0: i32) -> (i32, i32, i32) {
    %c0_i32 = arith.constant 0 : i32
    %c0_i32_0 = arith.constant 0 : i32
    %c0_i32_1 = arith.constant 0 : i32
    return %arg0, %c0_i32, %c0_i32_0 : i32, i32, i32
  }
  func.func @transform_14(%arg0: i32) -> (i32, i32, i32) {
    %c0_i32 = arith.constant 0 : i32
    %c0_i32_0 = arith.constant 0 : i32
    %c0_i32_1 = arith.constant 0 : i32
    return %arg0, %c0_i32, %c0_i32_0 : i32, i32, i32
  }
  func.func @transform_15(%arg0: i32) -> (i32, i32, i32) {
    %c0_i32 = arith.constant 0 : i32
    %c0_i32_0 = arith.constant 0 : i32
    %c0_i32_1 = arith.constant 0 : i32
    return %arg0, %c0_i32, %c0_i32_0 : i32, i32, i32
  }
  func.func @transform_16(%arg0: i32) -> (i32, i32) {
    %c0_i32 = arith.constant 0 : i32
    %c0_i32_0 = arith.constant 0 : i32
    %c0_i32_1 = arith.constant 0 : i32
    return %c0_i32, %c0_i32_0 : i32, i32
  }
}

</mosaic_0001>

<bundles_post_ra>
// kernel: bert_forward.1
= control target key start
LH: loop header
LB: loop body
LE: loop exit
PB: predicated region body
PF: predicated region fallthrough
CT: control target
= control target key end

     0   :  { %s2155_s21 = smov 0   ;;  %s2505_s0 = inlined_call_operand.vmem [shape: f32[16,32], index: 0, kind: input, shape index: {}]   ;;  %s2506_s1 = inlined_call_operand.vmem [shape: f32[2,8], index: 1, kind: input, shape index: {}]   ;;  %s2507_s2 = inlined_call_operand.vmem [shape: f32[1,32], index: 2, kind: input, shape index: {}]   ;;  %s2508_s3 = inlined_call_operand.vmem [shape: f32[1,32], index: 3, kind: input, shape index: {}]   ;;  %s2509_s4 = inlined_call_operand.vmem [shape: f32[2,32,96], index: 4, kind: input, shape index: {}]   ;;  %s2510_s5 = inlined_call_operand.vmem [shape: f32[2,1,96], index: 5, kind: input, shape index: {}]   ;;  %s2511_s6 = inlined_call_operand.vmem [shape: f32[2,32,32], index: 6, kind: input, shape index: {}]   ;;  %s2512_s7 = inlined_call_operand.vmem [shape: f32[2,1,32], index: 7, kind: input, shape index: {}]   ;;  %s2513_s8 = inlined_call_operand.vmem [shape: f32[2,1,32], index: 8, kind: input, shape index: {}]   ;;  %s2514_s9 = inlined_call_operand.vmem [shape: f32[2,1,32], index: 9, kind: input, shape index: {}]   ;;  %s2515_s10 = inlined_call_operand.vmem [shape: f32[2,32,64], index: 10, kind: input, shape index: {}]   ;;  %s2516_s11 = inlined_call_operand.vmem [shape: f32[2,1,64], index: 11, kind: input, shape index: {}]   ;;  %s2517_s12 = inlined_call_operand.vmem [shape: f32[2,64,32], index: 12, kind: input, shape index: {}]   ;;  %s2518_s13 = inlined_call_operand.vmem [shape: f32[2,1,32], index: 13, kind: input, shape index: {}]   ;;  %s2519_s14 = inlined_call_operand.vmem [shape: f32[2,1,32], index: 14, kind: input, shape index: {}]   ;;  %s2520_s15 = inlined_call_operand.vmem [shape: f32[2,1,32], index: 15, kind: input, shape index: {}]   ;;  %s2521_s16 = inlined_call_operand.vmem [shape: f32[16,32], index: 16, kind: output, shape index: {}]  }
   0x1   :  { %2526 = sst [smem:[#allocation7_spill]] %s2505_s0 }
   0x2   :  { %2527 = sst [smem:[#allocation8_spill]] %s2506_s1 }
   0x3   :  { %2528 = sst [smem:[#allocation9_spill]] %s2508_s3 }
   0x4   :  { %2529 = sst [smem:[#allocation10_spill]] %s2509_s4 }
   0x5   :  { %2530 = sst [smem:[#allocation11_spill]] %s2511_s6 }
   0x6   :  { %2531 = sst [smem:[#allocation12_spill]] %s2521_s16 }
   0x7 LB: > { %2532 = sst [smem:[#allocation5_spill]] %s2055_s21  ;;  %s2161_s22 = sadd.s32 4294967295, %s2055_s21   ;;  %s2055_s21 = sphi %s2155_s21, %s26_s21  }
   0x8   : > { %p1907_p0 = scmp.ge.s32.totalorder %s2055_s21, 1  ;;  %p551_p1 = scmp.lt.s32.totalorder %s2055_s21, 3 }
   0xa   : > { %p552_p2 = pnand %p1907_p0, %p551_p1 }
   0xc   : > { %555 = sbr.rel (%p552_p2) target bundleno = 3516 (0xdbc), region = 84 }
  0x11   : > { %p635_p3 = scmp.lt.s32.totalorder %s2161_s22, 1  ;;  %s2533_s4 = sld [smem:[#allocation10_spill]] }
  0x12   : > { %s2534_s6 = sld [smem:[#allocation11_spill]]  ;;  %p1916_p4 = scmp.ne.s32.totalorder %s2161_s22, 0 }
  0x13   : > { %s2167_s23 = scalar_select %p635_p3, %s2161_s22, 1 }
  0x14   : > { %s2536_s19 = sld [smem:[#allocation7_spill]] (!%p1916_p4) }
  0x15   : > { %s1958_s24 = sshll.u32 %s2167_s23, 5  ;;  %s672_s25 = scalar_lea.vmem %s2518_s13, %s2167_s23 }
  0x16   : > { %s675_s28 = scalar_lea.vmem %s2519_s14, %s2167_s23  ;;  %s678_s3 = scalar_lea.vmem %s2520_s15, %s2167_s23 }
  0x17   : > { %s2177_s30 = scalar_lea.vmem %s2533_s4, %s1958_s24  ;;  %s2199_s4 = scalar_lea.vmem %s2515_s10, %s1958_s24 }
  0x18   : > { %s2182_s18 = scalar_lea.vmem %s2534_s6, %s1958_s24  ;;  %s664_s6 = scalar_lea.vmem %s2516_s11, %s2167_s23 }
  0x19   : > { %2535 = sst [smem:[#allocation6_spill]] %s2182_s18  ;;  %s1961_s18 = sshll.u32 %s2167_s23, 6 }
  0x1a   : > { %s2209_s21 = scalar_lea.vmem %s2517_s12, %s1961_s18  ;;  %682 = sbr.rel (%p1916_p4) target bundleno = 309 (0x135), region = 88 }
  0x1b   : > { %s2537_s24 = sld [smem:[#allocation9_spill]] (!%p1916_p4) }
  0x1f   : > { %v683_v0 = vld [vmem:[%s2536_s19] sm:$0xff]  ;;  %vm687_vm0 = vcmask 261120   ;;  %v684_v2 = vld [vmem:[%s2536_s19 + $0x8] sm:$0xff]  ;;  %v2057_v4 = vmov 32.0  }
  0x20   : > { %v688_v1 = vsel %vm687_vm0, %v683_v0, 0.0  ;;  %v691_v3 = vsel %vm687_vm0, %v684_v2, 0.0  ;;  %1989 = vrcp.f32 %v2057_v4  ;;  %v1987_v35 = vld [vmem:[%s2507_s2] ss:$0 sm:$0xff] }
  0x21   : > { %689 = vadd.xlane.f32.xlu0 %v688_v1  ;;  %v1988_v38 = vld [vmem:[%s2537_s24] ss:$0 sm:$0xff] }
  0x26   : > { %v1990_v5 = vpop.eup %1989 }
  0x27   : > { %v695_v6 = vmul.f32 32.0, %v1990_v5  ;;  %vm699_vm1 = vweird.f32 %v1990_v5 }
  0x29   : > { %692 = vadd.xlane.f32.xlu0 %v691_v3  ;;  %v696_v7 = vsub.f32 1.0, %v695_v6 }
  0x2b   : > { %v697_v8 = vmul.f32 %v1990_v5, %v696_v7 }
  0x2d   : > { %v698_v9 = vadd.f32 %v1990_v5, %v697_v8 }
  0x2f   : > { %v700_v10 = vsel %vm699_vm1, %v1990_v5, %v698_v9 }
  0x94   : > { %v690_v11 = vpop.xlane.xlu0 %689 }
  0x95   : > { %v701_v12 = vmul.f32 %v700_v10, %v690_v11 }
  0x97   : > { %v703_v13 = vsub.f32 %v683_v0, %v701_v12 }
  0x99   : > { %v705_v14 = vmul.f32 %v703_v13, %v703_v13 }
  0x9b   : > { %v707_v15 = vsel %vm687_vm0, %v705_v14, 0.0 }
  0x9c   : > { %708 = vadd.xlane.f32.xlu1 %v707_v15  ;;  %v693_v16 = vpop.xlane.xlu0 %692 }
  0x9d   : > { %v702_v17 = vmul.f32 %v700_v10, %v693_v16 }
  0x9f   : > { %v704_v18 = vsub.f32 %v684_v2, %v702_v17 }
  0xa1   : > { %v706_v19 = vmul.f32 %v704_v18, %v704_v18 }
  0xa3   : > { %v710_v20 = vsel %vm687_vm0, %v706_v19, 0.0 }
  0xa4   : > { %711 = vadd.xlane.f32.xlu1 %v710_v20 }
 0x10f   : > { %v709_v21 = vpop.xlane.xlu1 %708 }
 0x110   : > { %v713_v22 = vmul.f32 %v709_v21, %v700_v10 }
 0x112   : > { %v715_v23 = vadd.f32 1e-12, %v713_v22 }
 0x114   : > { %1991 = vrsqrt.f32 %v715_v23  ;;  %vm723_vm3 = vweird.f32 %v715_v23 }
 0x117   : > { %v712_v24 = vpop.xlane.xlu1 %711 }
 0x118   : > { %v714_v25 = vmul.f32 %v712_v24, %v700_v10 }
 0x11a   : > { %v1992_v26 = vpop.eup %1991  ;;  %v716_v27 = vadd.f32 1e-12, %v714_v25 }
 0x11b   : > { %v718_v28 = vmul.f32 %v1992_v26, %v715_v23  ;;  %vm724_vm2 = vweird.f32 %v1992_v26 }
 0x11c   : > { %1993 = vrsqrt.f32 %v716_v27  ;;  %vm725_vm4 = vmor %vm723_vm3, %vm724_vm2  ;;  %vm733_vm6 = vweird.f32 %v716_v27 }
 0x11d   : > { %v719_v29 = vmul.f32 %v1992_v26, %v718_v28 }
 0x11f   : > { %v720_v30 = vmul.f32 0.5, %v719_v29 }
 0x121   : > { %v721_v31 = vsub.f32 1.5, %v720_v30 }
 0x122   : > { %v1994_v32 = vpop.eup %1993 }
 0x123   : > { %v722_v33 = vmul.f32 %v1992_v26, %v721_v31  ;;  %v728_v34 = vmul.f32 %v1994_v32, %v716_v27  ;;  %vm734_vm5 = vweird.f32 %v1994_v32 }
 0x124   : > { %vm735_vm7 = vmor %vm733_vm6, %vm734_vm5 }
 0x125   : > { %v726_v36 = vsel %vm725_vm4, %v1992_v26, %v722_v33  ;;  %v729_v37 = vmul.f32 %v1994_v32, %v728_v34 }
 0x126   : > { %v737_v39 = vmul.f32 %v726_v36, %v703_v13 }
 0x127   : > { %v730_v40 = vmul.f32 0.5, %v729_v37 }
 0x128   : > { %v742_v41 = vmul.f32 %v1987_v35, %v737_v39 }
 0x129   : > { %v731_v42 = vsub.f32 1.5, %v730_v40 }
 0x12a   : > { %v747_v43 = vadd.f32 %v1988_v38, %v742_v41 }
 0x12b   : > { %v732_v44 = vmul.f32 %v1994_v32, %v731_v42 }
 0x12c   : > { %749 = vst.msk [vmem:[#allocation4] sm:$0xff] %vm687_vm0, %v747_v43 }
 0x12d   : > { %v736_v45 = vsel %vm735_vm7, %v1994_v32, %v732_v44 }
 0x12e   : > { %v738_v46 = vmul.f32 %v736_v45, %v704_v18 }
 0x130   : > { %v743_v47 = vmul.f32 %v1987_v35, %v738_v46 }
 0x132   : > { %v748_v48 = vadd.f32 %v1988_v38, %v743_v47 }
 0x134   : > { %750 = vst.msk [vmem:[#allocation4 + $0x8] sm:$0xff] %vm687_vm0, %v748_v48 }
 0x135 PF: > { %v757_v49 = vld [vmem:[%s2177_s30 + $0x18] sm:$0xff]  ;;  %v756_v50 = vld [vmem:[%s2177_s30 + $0x10] sm:$0xff]  ;;  %v755_v51 = vld [vmem:[%s2177_s30 + $0x8] sm:$0xff]  ;;  %vm762_vm8 = vcmask 261120   ;;  %s2538_s17 = scalar_lea.vmem %s2510_s5, %s2167_s23  ;;  %vm792_vm9 = vcmask 785408   ;;  %s2059_s18 = smov 96  }
 0x136   : > { %781 = vmatpush.msra.mxu0 %v757_v49  ;;  %1962 = vmatpush.msra.mxu2 %v757_v49  ;;  %v754_v52 = vld [vmem:[%s2177_s30] sm:$0xff]  ;;  %s2058_s30 = smov 120   ;;  %s2060_s20 = smov 88   ;;  %vm799_vm10 = vcmask 64512   ;;  %vm1672_vm15 = vcmask 523264  }
 0x137   : > { %v2246_v53 = vld [vmem:[#allocation4] sm:$0xff]  ;;  %s2539_s16 = sld [smem:[#allocation8_spill]]  ;;  %s2061_s26 = smov 112  }
 0x138   : > { %782 = vmatpush.msra.mxu0 %v756_v50  ;;  %1963 = vmatpush.msra.mxu2 %v756_v50  ;;  %v1995_v54 = vld [vmem:[%s2538_s17] ss:$0 sm:$0xff]  ;;  %s2062_s24 = smov 72   ;;  %s2063_s29 = smov 64  }
 0x139   : > { %s2064_s0 = smov 56   ;;  %s2065_s17 = smov 80  }
 0x13a   : > { %783 = vmatpush.msra.mxu0 %v755_v51  ;;  %1964 = vmatpush.msra.mxu2 %v755_v51  ;;  %s2066_s27 = smov 48   ;;  %s2067_s1 = smov 104  }
 0x13b   : > { %v2264_v58 = vld [vmem:[#allocation4 + $0x8] sm:$0xff]  ;;  %p1955_p5 = scmp.ne.s32.totalorder %s2161_s22, 1 }
 0x13c   : > { %784 = vmatpush.msra.mxu0 %v754_v52  ;;  %1965 = vmatpush.msra.mxu2 %v754_v52 }
 0x13d   : > { %1917 = vmatmul.msk.f32.vlgmr.msra.gmra.mxu0 %vm762_vm8, %v2246_v53  ;;  %1918 = vmatmul.msk.f32.vlgmr.msra.gmra.mxu2 %vm762_vm8, %v2264_v58  ;;  %v2277_v0 = vld [vmem:[%s2539_s16] sm:$0x3]  ;;  %s2068_s16 = smov 40  }
 0x13e   : > { %v2280_v1 = vperm.slane %v2277_v0, 0 }
 0x1ba   : > { %v786_v55 = vpop.f32.mrf.mxu0 }
 0x1bb   : > { %v787_v56 = vadd.f32 %v1995_v54, %v786_v55 }
 0x1bd   : > { %793 = vst.msk [vmem:[#allocation2] sm:$0xff] %vm792_vm9, %v787_v56 }
 0x1c0   : > { %v789_v62 = vpop.f32.mrf.mxu2 }
 0x1c1   : > { %v790_v63 = vadd.f32 %v1995_v54, %v789_v62 }
 0x1c3   : > { %794 = vst.msk [vmem:[#allocation2 + $0x8] sm:$0xff] %vm792_vm9, %v790_v63 }
 0x1c4   : > { %v2256_v57 = vld [vmem:[#allocation2] sm:$0xff] }
 0x1c5   : > { %865 = vrot.lane.b32.xlu1 %v2256_v57, %s2058_s30  ;;  %797 = vrot.lane.b32.xlu0 %v2256_v57, %s2059_s18 }
 0x1ca   : > { %v2288_v10 = vld [vmem:[#allocation2 + $0x8] sm:$0xff] }
 0x1cd   : > { %867 = vrot.lane.b32.xlu0 %v2256_v57, %s2060_s20 }
 0x237   : > { %v798_v59 = vpop.permute.xlu0 %797  ;;  %v866_v61 = vpop.permute.xlu1 %865 }
 0x238   : > { %1919 = vmatpush.xpose.msk.msra.mxu1 %vm799_vm10, %v798_v59 }
 0x23b   : > { %1920 = vmatmul.msk.f32.vlgmr.msra.gmra.mxu1 %vm799_vm10, %v2256_v57 }
 0x23f   : > { %v868_v60 = vpop.permute.xlu0 %867 }
 0x240   : > { %1922 = vmatpush.xpose.msk.msra.mxu3 %vm799_vm10, %v868_v60 }
 0x243   : > { %1923 = vmatmul.msk.f32.vlgmr.msra.gmra.mxu3 %vm799_vm10, %v866_v61 }
 0x2b8   : > { %v821_v2 = vpop.f32.mrf.mxu1 }
 0x2b9   : > { %v824_v3 = vmul.f32 0.35355338, %v821_v2 }
 0x2bb   : > { %v826_v4 = vadd.f32 %v2280_v1, %v824_v3 }
 0x2bd   : > { %v827_v5 = vsel %vm799_vm10, %v826_v4, -inf }
 0x2be   : > { %828 = vmax.xlane.f32.xlu1 %v827_v5 }
 0x2c6   : > { %v890_v6 = vpop.f32.mrf.mxu3 }
 0x2c7   : > { %v893_v7 = vmul.f32 0.35355338, %v890_v6 }
 0x2c9   : > { %v894_v8 = vadd.f32 %v893_v7, %v2280_v1 }
 0x2cb   : > { %v895_v9 = vsel %vm799_vm10, %v894_v8, -inf }
 0x2cc   : > { %896 = vmax.xlane.f32.xlu2 %v895_v9 }
 0x2d7   : > { %979 = vrot.lane.b32.xlu1 %v2256_v57, %s2061_s26 }
 0x2df   : > { %1166 = vrot.lane.b32.xlu1 %v2288_v10, %s2059_s18  ;;  %s2540_s18 = sld [smem:[#allocation6_spill]] }
 0x2e5   : > { %v864_v31 = vld [vmem:[%s2540_s18] sm:$0xff]  ;;  %v932_v32 = vld [vmem:[%s2540_s18 + $0x8] sm:$0xff]  ;;  %v1046_v35 = vld [vmem:[%s2540_s18 + $0x10] sm:$0xff] }
 0x2e6   : > { %974 = vmatpush.msrb.mxu3 %v864_v31  ;;  %951 = vmatpush.msrb.mxu1 %v932_v32 }
 0x2e7   : > { %1073 = vrot.lane.b32.xlu1 %v2256_v57, %s2062_s24 }
 0x2e8   : > { %1065 = vmatpush.msra.mxu3 %v1046_v35 }
 0x331   : > { %v829_v11 = vpop.xlane.xlu1 %828 }
 0x332   : > { %v830_v12 = vsub.f32 %v826_v4, %v829_v11  ;;  %v2338_v4 = vperm.slane %v2277_v0, 1 }
 0x334   : > { %v831_v13 = vmul.f32 1.442695, %v830_v12 }
 0x336   : > { %2003 = vpow2.f32 %v831_v13 }
 0x33c   : > { %v2004_v14 = vpop.eup %2003 }
 0x33d   : > { %v833_v15 = vsel %vm799_vm10, %v2004_v14, 0.0 }
 0x33e   : > { %834 = vadd.xlane.f32.xlu2 %v833_v15 }
 0x33f   : > { %v897_v16 = vpop.xlane.xlu2 %896 }
 0x340   : > { %v898_v17 = vsub.f32 %v894_v8, %v897_v16 }
 0x342   : > { %v899_v18 = vmul.f32 1.442695, %v898_v17 }
 0x344   : > { %2005 = vpow2.f32 %v899_v18 }
 0x349   : > { %v980_v30 = vpop.permute.xlu1 %979 }
 0x34a   : > { %v2006_v19 = vpop.eup %2005 }
 0x34b   : > { %v901_v20 = vsel %vm799_vm10, %v2006_v19, 0.0 }
 0x34c   : > { %902 = vadd.xlane.f32.xlu0 %v901_v20 }
 0x351   : > { %v1167_v36 = vpop.permute.xlu1 %1166 }
 0x356   : > { %838 = vrot.lane.b32.xlu2 %v2256_v57, %s2063_s29 }
 0x359   : > { %v1074_v51 = vpop.permute.xlu1 %1073 }
 0x35e   : > { %906 = vrot.lane.b32.xlu2 %v2256_v57, %s2064_s0 }
 0x366   : > { %981 = vrot.lane.b32.xlu2 %v2256_v57, %s2065_s17 }
 0x3b1   : > { %v835_v21 = vpop.xlane.xlu2 %834 }
 0x3b2   : > { %2007 = vrcp.f32 %v835_v21 }
 0x3b8   : > { %v2008_v22 = vpop.eup %2007 }
 0x3b9   : > { %v839_v23 = vpop.permute.xlu2 %838  ;;  %v837_v24 = vmul.f32 %v2008_v22, %v2004_v14 }
 0x3ba   : > { %859 = vmatpush.msrb.mxu2 %v839_v23 }
 0x3bb   : > { %1921 = vmatmul.msk.f32.vlgmr.msrb.gmra.mxu2 %vm799_vm10, %v837_v24 }
 0x3bf   : > { %v903_v25 = vpop.xlane.xlu0 %902 }
 0x3c0   : > { %2009 = vrcp.f32 %v903_v25 }
 0x3c1   : > { %v907_v26 = vpop.permute.xlu2 %906 }
 0x3c2   : > { %927 = vmatpush.msra.mxu2 %v907_v26 }
 0x3c6   : > { %v2010_v27 = vpop.eup %2009 }
 0x3c7   : > { %v905_v28 = vmul.f32 %v2010_v27, %v2006_v19  ;;  %v2364_v27 = vld [vmem:[%s2540_s18 + $0x18] sm:$0xff]  ;;  %s2543_s18 = scalar_lea.vmem %s2514_s9, %s2167_s23 }
 0x3c9   : > { %1924 = vmatmul.msk.f32.vlgmr.msra.gmra.mxu2 %vm799_vm10, %v905_v28  ;;  %v982_v29 = vpop.permute.xlu2 %981 }
 0x3ca   : > { %1927 = vmatpush.xpose.msk.msrb.mxu2 %vm799_vm10, %v982_v29 }
 0x3d1   : > { %1928 = vmatmul.msk.f32.vlgmr.msrb.gmra.mxu2 %vm799_vm10, %v980_v30 }
 0x43e   : > { %v861_v33 = vpop.f32.mrf.mxu2 }
 0x43f   : > { %1926 = vmatmul.msk.f32.vlgmr.msrb.gmra.mxu3 %vm799_vm10, %v861_v33 }
 0x440   : > { %1935 = vmatpush.xpose.msk.msrb.mxu3 %vm799_vm10, %v1167_v36 }
 0x44c   : > { %v929_v34 = vpop.f32.mrf.mxu2 }
 0x44d   : > { %1925 = vmatmul.msk.f32.vlgmr.msrb.gmra.mxu1 %vm799_vm10, %v929_v34 }
 0x454   : > { %v1004_v37 = vpop.f32.mrf.mxu2 }
 0x455   : > { %v1007_v38 = vmul.f32 0.35355338, %v1004_v37 }
 0x457   : > { %v1008_v39 = vadd.f32 %v1007_v38, %v2280_v1 }
 0x459   : > { %v1009_v40 = vsel %vm799_vm10, %v1008_v39, -inf }
 0x45a   : > { %1010 = vmax.xlane.f32.xlu2 %v1009_v40 }
 0x472   : > { %1206 = vrot.lane.b32.xlu2 %v2288_v10, %s2063_s29  ;;  %s2542_s29 = scalar_lea.vmem %s2513_s8, %s2167_s23 }
 0x4c2   : > { %v2333_v62 = vpop.f32.mrf.mxu3 }
 0x4ca   : > { %v2324_v54 = vpop.f32.mrf.mxu1 }
 0x4cd   : > { %v1011_v41 = vpop.xlane.xlu2 %1010 }
 0x4ce   : > { %v1012_v42 = vsub.f32 %v1008_v39, %v1011_v41 }
 0x4d0   : > { %v1013_v43 = vmul.f32 1.442695, %v1012_v42 }
 0x4d2   : > { %2011 = vpow2.f32 %v1013_v43 }
 0x4d5   : > { %v1207_v44 = vpop.permute.xlu2 %1206 }
 0x4d6   : > { %1227 = vmatpush.msrb.mxu0 %v1207_v44  ;;  %v977_v44 = vadd.f32 %v2333_v62, %v2324_v54 }
 0x4d8   : > { %1342 = vmatpush.msra.mxu0 %v864_v31  ;;  %v2012_v45 = vpop.eup %2011 }
 0x4d9   : > { %v1015_v46 = vsel %vm799_vm10, %v2012_v45, 0.0 }
 0x4da   : > { %1016 = vadd.xlane.f32.xlu0 %v1015_v46 }
 0x4ee   : > { %1020 = vrot.lane.b32.xlu0 %v2256_v57, %s2066_s27 }
 0x4f6   : > { %1071 = vrot.lane.b32.xlu0 %v2256_v57, %s2067_s1 }
 0x54d   : > { %v1017_v47 = vpop.xlane.xlu0 %1016 }
 0x54e   : > { %2013 = vrcp.f32 %v1017_v47 }
 0x554   : > { %v2014_v48 = vpop.eup %2013 }
 0x555   : > { %v1019_v49 = vmul.f32 %v2014_v48, %v2012_v45 }
 0x560   : > { %v1021_v50 = vpop.permute.xlu0 %1020 }
 0x561   : > { %1041 = vmatpush.msra.mxu1 %v1021_v50 }
 0x562   : > { %1929 = vmatmul.msk.f32.vlgmr.msra.gmra.mxu1 %vm799_vm10, %v1019_v49 }
 0x563   : > { %1931 = vmatpush.xpose.msk.msrb.mxu1 %vm799_vm10, %v1074_v51 }
 0x567   : > { %1157 = vmatpush.msra.mxu1 %v2364_v27 }
 0x568   : > { %v1072_v52 = vpop.permute.xlu0 %1071 }
 0x56a   : > { %1932 = vmatmul.msk.f32.vlgmr.msrb.gmra.mxu1 %vm799_vm10, %v1072_v52 }
 0x5df   : > { %v1043_v55 = vpop.f32.mrf.mxu1 }
 0x5e0   : > { %1930 = vmatmul.msk.f32.vlgmr.msra.gmra.mxu3 %vm799_vm10, %v1043_v55 }
 0x5e1   : > { %1319 = vmatpush.msra.mxu3 %v932_v32 }
 0x5e7   : > { %v1096_v56 = vpop.f32.mrf.mxu1 }
 0x5e8   : > { %v1099_v59 = vmul.f32 0.35355338, %v1096_v56  ;;  %1936 = vmatmul.msk.f32.vlgmr.msrb.gmra.mxu3 %vm799_vm10, %v2288_v10 }
 0x5e9   : > { %1433 = vmatpush.msrb.mxu3 %v1046_v35 }
 0x5ea   : > { %v1100_v60 = vadd.f32 %v1099_v59, %v2280_v1 }
 0x5ec   : > { %v1101_v61 = vsel %vm799_vm10, %v1100_v60, -inf }
 0x5ed   : > { %1102 = vmax.xlane.f32.xlu2 %v1101_v61 }
 0x605   : > { %1349 = vrot.lane.b32.xlu2 %v2288_v10, %s2065_s17 }
 0x660   : > { %v1103_v2 = vpop.xlane.xlu2 %1102 }
 0x661   : > { %v1104_v3 = vsub.f32 %v1100_v60, %v1103_v2 }
 0x663   : > { %v2335_v63 = vpop.f32.mrf.mxu3  ;;  %v1105_v5 = vmul.f32 1.442695, %v1104_v3 }
 0x664   : > { %v1070_v45 = vadd.f32 %v2335_v63, %v977_v44 }
 0x665   : > { %2015 = vpow2.f32 %v1105_v5 }
 0x668   : > { %v1350_v24 = vpop.permute.xlu2 %1349 }
 0x66b   : > { %v1189_v6 = vpop.f32.mrf.mxu3  ;;  %v2016_v9 = vpop.eup %2015 }
 0x66c   : > { %v1192_v7 = vmul.f32 0.35355338, %v1189_v6  ;;  %v1107_v11 = vsel %vm799_vm10, %v2016_v9, 0.0 }
 0x66e   : > { %v1194_v1 = vadd.f32 %v2338_v4, %v1192_v7 }
 0x670   : > { %v1195_v8 = vsel %vm799_vm10, %v1194_v1, -inf }
 0x671   : > { %1196 = vmax.xlane.f32.xlu1 %v1195_v8 }
 0x679   : > { %1108 = vadd.xlane.f32.xlu1 %v1107_v11 }
 0x692   : > { %1235 = vrot.lane.b32.xlu1 %v2288_v10, %s2060_s20 }
 0x69a   : > { %1441 = vrot.lane.b32.xlu1 %v2288_v10, %s2062_s24 }
 0x6e4   : > { %v1197_v0 = vpop.xlane.xlu1 %1196 }
 0x6e5   : > { %v1198_v12 = vsub.f32 %v1194_v1, %v1197_v0 }
 0x6e7   : > { %v1199_v13 = vmul.f32 1.442695, %v1198_v12 }
 0x6e9   : > { %2017 = vpow2.f32 %v1199_v13 }
 0x6ec   : > { %v1109_v16 = vpop.xlane.xlu1 %1108 }
 0x6ef   : > { %v2018_v14 = vpop.eup %2017 }
 0x6f0   : > { %v1201_v15 = vsel %vm799_vm10, %v2018_v14, 0.0 }
 0x6f1   : > { %1202 = vadd.xlane.f32.xlu0 %v1201_v15  ;;  %v2069_v15 = vmov 32.0  }
 0x704   : > { %v1236_v17 = vpop.permute.xlu1 %1235 }
 0x705   : > { %1112 = vrot.lane.b32.xlu0 %v2256_v57, %s2068_s16 }
 0x70c   : > { %v1442_v21 = vpop.permute.xlu1 %1441 }
 0x70d   : > { %1233 = vrot.lane.b32.xlu0 %v2288_v10, %s2058_s30 }
 0x715   : > { %1347 = vrot.lane.b32.xlu0 %v2288_v10, %s2061_s26  ;;  %s2541_s26 = scalar_lea.vmem %s2512_s7, %s2167_s23 }
 0x716   : > { %v2393_v61 = vld [vmem:[%s2541_s26] ss:$0 sm:$0xff] }
 0x71d   : > { %1439 = vrot.lane.b32.xlu0 %v2288_v10, %s2067_s1 }
 0x764   : > { %v1203_v18 = vpop.xlane.xlu0 %1202 }
 0x765   : > { %2019 = vrcp.f32 %v1203_v18 }
 0x766   : > { %2021 = vrcp.f32 %v1109_v16 }
 0x76b   : > { %v2020_v19 = vpop.eup %2019 }
 0x76c   : > { %v1205_v20 = vmul.f32 %v2020_v19, %v2018_v14  ;;  %v2022_v57 = vpop.eup %2021 }
 0x76d   : > { %v1111_v22 = vmul.f32 %v2022_v57, %v2016_v9 }
 0x76e   : > { %1937 = vmatmul.msk.f32.vlgmr.msrb.gmra.mxu0 %vm799_vm10, %v1205_v20 }
 0x76f   : > { %1947 = vmatpush.xpose.msk.msrb.mxu0 %vm799_vm10, %v1442_v21 }
 0x777   : > { %v1113_v23 = vpop.permute.xlu0 %1112 }
 0x778   : > { %1133 = vmatpush.msra.mxu2 %v1113_v23 }
 0x779   : > { %1933 = vmatmul.msk.f32.vlgmr.msra.gmra.mxu2 %vm799_vm10, %v1111_v22 }
 0x77a   : > { %1938 = vmatpush.xpose.msk.msrb.mxu2 %vm799_vm10, %v1236_v17 }
 0x77e   : > { %1943 = vmatpush.xpose.msk.msra.mxu2 %vm799_vm10, %v1350_v24 }
 0x77f   : > { %v1234_v25 = vpop.permute.xlu0 %1233 }
 0x781   : > { %1939 = vmatmul.msk.f32.vlgmr.msrb.gmra.mxu2 %vm799_vm10, %v1234_v25 }
 0x787   : > { %v1348_v26 = vpop.permute.xlu0 %1347 }
 0x789   : > { %1944 = vmatmul.msk.f32.vlgmr.msra.gmra.mxu2 %vm799_vm10, %v1348_v26 }
 0x78f   : > { %v1440_v29 = vpop.permute.xlu0 %1439 }
 0x7eb   : > { %v1229_v28 = vpop.f32.mrf.mxu0 }
 0x7ec   : > { %1942 = vmatmul.msk.f32.vlgmr.msra.gmra.mxu0 %vm799_vm10, %v1229_v28 }
 0x7f4   : > { %1948 = vmatmul.msk.f32.vlgmr.msrb.gmra.mxu0 %vm799_vm10, %v1440_v29 }
 0x7fc   : > { %v1135_v30 = vpop.f32.mrf.mxu2 }
 0x7fd   : > { %1934 = vmatmul.msk.f32.vlgmr.msra.gmra.mxu1 %vm799_vm10, %v1135_v30 }
 0x804   : > { %v1258_v31 = vpop.f32.mrf.mxu2 }
 0x805   : > { %v1261_v32 = vmul.f32 0.35355338, %v1258_v31  ;;  %v1608_v31 = vld [vmem:[%s2199_s4 + $0x18] sm:$0xff] }
 0x807   : > { %v1262_v33 = vadd.f32 %v1261_v32, %v2338_v4  ;;  %v1607_v32 = vld [vmem:[%s2199_s4 + $0x10] sm:$0xff] }
 0x809   : > { %v1263_v34 = vsel %vm799_vm10, %v1262_v33, -inf }
 0x80a   : > { %1264 = vmax.xlane.f32.xlu1 %v1263_v34  ;;  %v1605_v34 = vld [vmem:[%s2199_s4] sm:$0xff] }
 0x80c   : > { %v1372_v35 = vpop.f32.mrf.mxu2 }
 0x80d   : > { %v1375_v36 = vmul.f32 0.35355338, %v1372_v35 }
 0x80f   : > { %v1376_v37 = vadd.f32 %v1375_v36, %v2338_v4 }
 0x811   : > { %v1377_v38 = vsel %vm799_vm10, %v1376_v37, -inf }
 0x812   : > { %1378 = vmax.xlane.f32.xlu0 %v1377_v38 }
 0x869   : > { %v2374_v39 = vpop.f32.mrf.mxu0 }
 0x871   : > { %v1464_v40 = vpop.f32.mrf.mxu0 }
 0x872   : > { %v1467_v41 = vmul.f32 0.35355338, %v1464_v40 }
 0x874   : > { %v1468_v42 = vadd.f32 %v1467_v41, %v2338_v4 }
 0x876   : > { %v1469_v43 = vsel %vm799_vm10, %v1468_v42, -inf }
 0x877   : > { %1470 = vmax.xlane.f32.xlu2 %v1469_v43 }
 0x87a   : > { %v1159_v46 = vpop.f32.mrf.mxu1 }
 0x87b   : > { %v1162_v47 = vadd.f32 %v1159_v46, %v1070_v45  ;;  %v2421_v45 = vld [vmem:[%s2542_s29] ss:$0 sm:$0xff] }
 0x87d   : > { %1163 = vst.msk [vmem:[#allocation3] sm:$0xff] %vm762_vm8, %v1162_v47  ;;  %v1265_v48 = vpop.xlane.xlu1 %1264 }
 0x87e   : > { %v1266_v49 = vsub.f32 %v1262_v33, %v1265_v48  ;;  %v1606_v33 = vld [vmem:[%s2199_s4 + $0x8] sm:$0xff]  ;;  %v2428_v48 = vld [vmem:[%s2543_s18] ss:$0 sm:$0xff] }
 0x880   : > { %v1267_v50 = vmul.f32 1.442695, %v1266_v49 }
 0x882   : > { %2023 = vpow2.f32 %v1267_v50 }
 0x884   : > { %v1532_v62 = vld [vmem:[#allocation3] sm:$0xff] }
 0x885   : > { %v1379_v51 = vpop.xlane.xlu0 %1378  ;;  %v1538_v63 = vadd.f32 %v2393_v61, %v1532_v62  ;;  %v1662_v62 = vld [vmem:[%s2209_s21 + $0x10] sm:$0xff] }
 0x886   : > { %v1380_v52 = vsub.f32 %v1376_v37, %v1379_v51 }
 0x887   : > { %v1540_v2 = vadd.f32 %v1538_v63, %v2246_v53  ;;  %v1661_v63 = vld [vmem:[%s2209_s21 + $0x8] sm:$0xff] }
 0x888   : > { %v2024_v55 = vpop.eup %2023  ;;  %v1381_v56 = vmul.f32 1.442695, %v1380_v52  ;;  %v1667_v52 = vld [vmem:[%s2209_s21 + $0x38] sm:$0xff] }
 0x889   : > { %v1269_v59 = vsel %vm799_vm10, %v2024_v55, 0.0  ;;  %v1544_v3 = vsel %vm762_vm8, %v1540_v2, 0.0  ;;  %1687 = vmatpush.msra.mxu0 %v1667_v52 }
 0x88a   : > { %2025 = vpow2.f32 %v1381_v56  ;;  %1270 = vadd.xlane.f32.xlu1 %v1269_v59  ;;  %v1665_v56 = vld [vmem:[%s2209_s21 + $0x28] sm:$0xff]  ;;  %v1664_v59 = vld [vmem:[%s2209_s21 + $0x20] sm:$0xff] }
 0x890   : > { %v2026_v54 = vpop.eup %2025 }
 0x891   : > { %v1383_v60 = vsel %vm799_vm10, %v2026_v54, 0.0 }
 0x892   : > { %1384 = vadd.xlane.f32.xlu0 %v1383_v60  ;;  %v1663_v60 = vld [vmem:[%s2209_s21 + $0x18] sm:$0xff] }
 0x8a3   : > { %1274 = vrot.lane.b32.xlu1 %v2288_v10, %s2064_s0 }
 0x8a6   : > { %1388 = vrot.lane.b32.xlu0 %v2288_v10, %s2066_s27 }
 0x8cd   : > { %1545 = vadd.xlane.f32.xlu1 %v1544_v3 }
 0x8ea   : > { %v1471_v4 = vpop.xlane.xlu2 %1470 }
 0x8eb   : > { %v1472_v5 = vsub.f32 %v1468_v42, %v1471_v4  ;;  %v2447_v4 = vld [vmem:[%s664_s6] ss:$0 sm:$0xff] }
 0x8ed   : > { %v1473_v6 = vmul.f32 1.442695, %v1472_v5 }
 0x8ef   : > { %2027 = vpow2.f32 %v1473_v6 }
 0x8f5   : > { %v2028_v7 = vpop.eup %2027 }
 0x8f6   : > { %v1475_v1 = vsel %vm799_vm10, %v2028_v7, 0.0 }
 0x8f7   : > { %1476 = vadd.xlane.f32.xlu2 %v1475_v1 }
 0x8fd   : > { %v1271_v8 = vpop.xlane.xlu1 %1270 }
 0x8fe   : > { %2029 = vrcp.f32 %v1271_v8 }
 0x904   : > { %v2030_v11 = vpop.eup %2029 }
 0x905   : > { %v1385_v9 = vpop.xlane.xlu0 %1384  ;;  %v1273_v53 = vmul.f32 %v2030_v11, %v2024_v55  ;;  %v1666_v55 = vld [vmem:[%s2209_s21 + $0x30] sm:$0xff] }
 0x906   : > { %2031 = vrcp.f32 %v1385_v9  ;;  %1688 = vmatpush.msra.mxu0 %v1666_v55 }
 0x907   : > { %2033 = vrcp.f32 %v2069_v15 }
 0x908   : > { %1689 = vmatpush.msra.mxu0 %v1665_v56 }
 0x90a   : > { %1690 = vmatpush.msra.mxu0 %v1664_v59 }
 0x90c   : > { %v2032_v13 = vpop.eup %2031  ;;  %1691 = vmatpush.msra.mxu0 %v1663_v60 }
 0x90d   : > { %v1387_v14 = vmul.f32 %v2032_v13, %v2026_v54  ;;  %v2034_v16 = vpop.eup %2033 }
 0x90e   : > { %vm1555_vm11 = vweird.f32 %v2034_v16  ;;  %1692 = vmatpush.msra.mxu0 %v1662_v62  ;;  %v2002_v62 = vld [vmem:[%s678_s3] ss:$0 sm:$0xff] }
 0x90f   : > { %1480 = vrot.lane.b32.xlu2 %v2288_v10, %s2068_s16  ;;  %v1551_v10 = vmul.f32 32.0, %v2034_v16 }
 0x910   : > { %1693 = vmatpush.msra.mxu0 %v1661_v63 }
 0x911   : > { %v1552_v17 = vsub.f32 1.0, %v1551_v10 }
 0x913   : > { %v1553_v18 = vmul.f32 %v2034_v16, %v1552_v17 }
 0x915   : > { %v1275_v0 = vpop.permute.xlu1 %1274  ;;  %v1554_v19 = vadd.f32 %v2034_v16, %v1553_v18 }
 0x916   : > { %1295 = vmatpush.msrb.mxu1 %v1275_v0 }
 0x917   : > { %1940 = vmatmul.msk.f32.vlgmr.msrb.gmra.mxu1 %vm799_vm10, %v1273_v53  ;;  %v2404_v20 = vsel %vm1555_vm11, %v2034_v16, %v1554_v19 }
 0x918   : > { %v1389_v12 = vpop.permute.xlu0 %1388 }
 0x919   : > { %1409 = vmatpush.msra.mxu1 %v1389_v12 }
 0x91b   : > { %1525 = vmatpush.msrb.mxu1 %v2364_v27 }
 0x91f   : > { %1945 = vmatmul.msk.f32.vlgmr.msra.gmra.mxu1 %vm799_vm10, %v1387_v14 }
 0x940   : > { %v1546_v21 = vpop.xlane.xlu1 %1545 }
 0x941   : > { %v1557_v57 = vmul.f32 %v2404_v20, %v1546_v21 }
 0x943   : > { %v1559_v22 = vsub.f32 %v1540_v2, %v1557_v57  ;;  %v1660_v2 = vld [vmem:[%s2209_s21] sm:$0xff] }
 0x944   : > { %1694 = vmatpush.msra.mxu0 %v1660_v2 }
 0x945   : > { %v1561_v23 = vmul.f32 %v1559_v22, %v1559_v22 }
 0x947   : > { %v1563_v24 = vsel %vm762_vm8, %v1561_v23, 0.0 }
 0x948   : > { %1564 = vadd.xlane.f32.xlu2 %v1563_v24 }
 0x96a   : > { %v1477_v25 = vpop.xlane.xlu2 %1476 }
 0x96b   : > { %2035 = vrcp.f32 %v1477_v25 }
 0x971   : > { %v2036_v26 = vpop.eup %2035 }
 0x972   : > { %v1479_v27 = vmul.f32 %v2036_v26, %v2028_v7  ;;  %v1481_v28 = vpop.permute.xlu2 %1480 }
 0x973   : > { %1501 = vmatpush.msrb.mxu2 %v1481_v28 }
 0x974   : > { %1949 = vmatmul.msk.f32.vlgmr.msrb.gmra.mxu2 %vm799_vm10, %v1479_v27 }
 0x994   : > { %v1297_v29 = vpop.f32.mrf.mxu1 }
 0x995   : > { %1941 = vmatmul.msk.f32.vlgmr.msra.gmra.mxu3 %vm799_vm10, %v1297_v29 }
 0x996   : > { %1631 = vmatpush.msra.mxu3 %v1608_v31 }
 0x998   : > { %1632 = vmatpush.msra.mxu3 %v1607_v32 }
 0x99a   : > { %1633 = vmatpush.msra.mxu3 %v1606_v33 }
 0x99c   : > { %v1411_v30 = vpop.f32.mrf.mxu1  ;;  %1634 = vmatpush.msra.mxu3 %v1605_v34 }
 0x99d   : > { %1946 = vmatmul.msk.f32.vlgmr.msrb.gmra.mxu3 %vm799_vm10, %v1411_v30 }
 0x9bb   : > { %v1565_v35 = vpop.xlane.xlu2 %1564 }
 0x9bc   : > { %v1569_v36 = vmul.f32 %v1565_v35, %v2404_v20 }
 0x9be   : > { %v1571_v37 = vadd.f32 1e-12, %v1569_v36 }
 0x9c0   : > { %2037 = vrsqrt.f32 %v1571_v37  ;;  %vm1579_vm13 = vweird.f32 %v1571_v37 }
 0x9c6   : > { %v2038_v38 = vpop.eup %2037 }
 0x9c7   : > { %v1574_v40 = vmul.f32 %v2038_v38, %v1571_v37  ;;  %vm1580_vm12 = vweird.f32 %v2038_v38 }
 0x9c8   : > { %vm1581_vm14 = vmor %vm1579_vm13, %vm1580_vm12 }
 0x9c9   : > { %v1575_v41 = vmul.f32 %v2038_v38, %v1574_v40 }
 0x9cb   : > { %v1576_v42 = vmul.f32 0.5, %v1575_v41 }
 0x9cd   : > { %v1577_v43 = vsub.f32 1.5, %v1576_v42 }
 0x9cf   : > { %v1578_v44 = vmul.f32 %v2038_v38, %v1577_v43 }
 0x9d1   : > { %v1582_v46 = vsel %vm1581_vm14, %v2038_v38, %v1578_v44 }
 0x9d2   : > { %v1593_v47 = vmul.f32 %v1582_v46, %v1559_v22 }
 0x9d4   : > { %v1598_v49 = vmul.f32 %v2421_v45, %v1593_v47 }
 0x9d6   : > { %v1603_v50 = vadd.f32 %v2428_v48, %v1598_v49 }
 0x9d8   : > { %1951 = vmatmul.msk.f32.vlgmr.msra.gmra.mxu3 %vm762_vm8, %v1603_v50 }
 0x9f7   : > { %v1503_v51 = vpop.f32.mrf.mxu2 }
 0x9f8   : > { %1950 = vmatmul.msk.f32.vlgmr.msrb.gmra.mxu1 %vm799_vm10, %v1503_v51 }
 0xa18   : > { %v1321_v54 = vpop.f32.mrf.mxu3 }
 0xa19   : > { %v1345_v14 = vadd.f32 %v2374_v39, %v1321_v54  ;;  %v2461_v39 = vld [vmem:[%s672_s25] ss:$0 sm:$0xff] }
 0xa20   : > { %v1435_v3 = vpop.f32.mrf.mxu3 }
 0xa21   : > { %v1438_v15 = vadd.f32 %v1435_v3, %v1345_v14 }
 0xa5b   : > { %v1636_v5 = vpop.f32.mrf.mxu3 }
 0xa5c   : > { %v1637_v6 = vadd.f32 %v2447_v4, %v1636_v5 }
 0xa5e   : > { %v1644_v7 = vmul.f32 0.044715, %v1637_v6  ;;  %v1642_v0 = vmul.f32 0.5, %v1637_v6 }
 0xa60   : > { %v1646_v1 = vmul.f32 %v1644_v7, %v1637_v6 }
 0xa62   : > { %v1648_v8 = vmul.f32 %v1646_v1, %v1637_v6 }
 0xa64   : > { %v1650_v9 = vadd.f32 %v1648_v8, %v1637_v6 }
 0xa66   : > { %v1652_v11 = vmul.f32 0.7978846, %v1650_v9 }
 0xa68   : > { %2039 = vtanh.f32 %v1652_v11 }
 0xa6e   : > { %v2040_v53 = vpop.eup %2039 }
 0xa6f   : > { %v1656_v12 = vadd.f32 1.0, %v2040_v53 }
 0xa71   : > { %v1658_v13 = vmul.f32 %v1656_v12, %v1642_v0 }
 0xa73   : > { %1953 = vmatmul.msk.f32.vlgmr.msra.gmra.mxu0 %vm1672_vm15, %v1658_v13 }
 0xa75   : > { %v1527_v16 = vpop.f32.mrf.mxu1 }
 0xa76   : > { %v1530_v10 = vadd.f32 %v1527_v16, %v1438_v15 }
 0xa78   : > { %1531 = vst.msk [vmem:[#allocation3 + $0x8] sm:$0xff] %vm762_vm8, %v1530_v10 }
 0xa7f   : > { %v1533_v17 = vld [vmem:[#allocation3 + $0x8] sm:$0xff] }
 0xa80   : > { %v1539_v18 = vadd.f32 %v2393_v61, %v1533_v17 }
 0xa82   : > { %v1541_v19 = vadd.f32 %v1539_v18, %v2264_v58 }
 0xa84   : > { %v1547_v21 = vsel %vm762_vm8, %v1541_v19, 0.0 }
 0xa85   : > { %1548 = vadd.xlane.f32.xlu0 %v1547_v21 }
 0xaf0   : > { %v1696_v57 = vpop.f32.mrf.mxu0 }
 0xaf1   : > { %v1697_v22 = vadd.f32 %v2461_v39, %v1696_v57 }
 0xaf3   : > { %v1702_v23 = vadd.f32 %v1697_v22, %v1603_v50 }
 0xaf5   : > { %v1706_v24 = vsel %vm762_vm8, %v1702_v23, 0.0 }
 0xaf6   : > { %1707 = vadd.xlane.f32.xlu0 %v1706_v24 }
 0xaf8   : > { %v1549_v25 = vpop.xlane.xlu0 %1548 }
 0xaf9   : > { %v1558_v61 = vmul.f32 %v2404_v20, %v1549_v25 }
 0xafb   : > { %v1560_v58 = vsub.f32 %v1541_v19, %v1558_v61 }
 0xafd   : > { %v1562_v26 = vmul.f32 %v1560_v58, %v1560_v58 }
 0xaff   : > { %v1566_v27 = vsel %vm762_vm8, %v1562_v26, 0.0 }
 0xb00   : > { %1567 = vadd.xlane.f32.xlu1 %v1566_v27 }
 0xb69   : > { %v1708_v28 = vpop.xlane.xlu0 %1707 }
 0xb6a   : > { %v1712_v29 = vmul.f32 %v1708_v28, %v2404_v20 }
 0xb6c   : > { %v1714_v30 = vsub.f32 %v1702_v23, %v1712_v29 }
 0xb6e   : > { %v1716_v31 = vmul.f32 %v1714_v30, %v1714_v30 }
 0xb70   : > { %v1718_v32 = vsel %vm762_vm8, %v1716_v31, 0.0 }
 0xb71   : > { %1719 = vadd.xlane.f32.xlu0 %v1718_v32 }
 0xb73   : > { %v1568_v33 = vpop.xlane.xlu1 %1567 }
 0xb74   : > { %v1570_v34 = vmul.f32 %v1568_v33, %v2404_v20 }
 0xb76   : > { %v1572_v35 = vadd.f32 1e-12, %v1570_v34 }
 0xb78   : > { %2041 = vrsqrt.f32 %v1572_v35  ;;  %vm1589_vm1 = vweird.f32 %v1572_v35 }
 0xb7e   : > { %v2042_v36 = vpop.eup %2041 }
 0xb7f   : > { %v1584_v37 = vmul.f32 %v2042_v36, %v1572_v35  ;;  %vm1590_vm0 = vweird.f32 %v2042_v36 }
 0xb80   : > { %vm1591_vm2 = vmor %vm1589_vm1, %vm1590_vm0 }
 0xb81   : > { %v1585_v38 = vmul.f32 %v2042_v36, %v1584_v37 }
 0xb83   : > { %v1586_v40 = vmul.f32 0.5, %v1585_v38 }
 0xb85   : > { %v1587_v41 = vsub.f32 1.5, %v1586_v40 }
 0xb87   : > { %v1588_v42 = vmul.f32 %v2042_v36, %v1587_v41 }
 0xb89   : > { %v1592_v43 = vsel %vm1591_vm2, %v2042_v36, %v1588_v42 }
 0xb8a   : > { %v1594_v44 = vmul.f32 %v1592_v43, %v1560_v58 }
 0xb8c   : > { %v1599_v46 = vmul.f32 %v2421_v45, %v1594_v44  ;;  %v2001_v45 = vld [vmem:[%s675_s28] ss:$0 sm:$0xff]  ;;  %s2544_s28 = sld [smem:[#allocation12_spill]] (!%p1955_p5) }
 0xb8e   : > { %v1604_v47 = vadd.f32 %v2428_v48, %v1599_v46 }
 0xb90   : > { %1952 = vmatmul.msk.f32.gmra.mxu3 %vm762_vm8, %v1604_v47 }
 0xbe4   : > { %v1720_v49 = vpop.xlane.xlu0 %1719 }
 0xbe5   : > { %v1724_v50 = vmul.f32 %v1720_v49, %v2404_v20 }
 0xbe7   : > { %v1726_v51 = vadd.f32 1e-12, %v1724_v50 }
 0xbe9   : > { %2043 = vrsqrt.f32 %v1726_v51  ;;  %vm1734_vm4 = vweird.f32 %v1726_v51 }
 0xbef   : > { %v2044_v52 = vpop.eup %2043 }
 0xbf0   : > { %v1729_v55 = vmul.f32 %v2044_v52, %v1726_v51  ;;  %vm1735_vm3 = vweird.f32 %v2044_v52 }
 0xbf1   : > { %vm1736_vm5 = vmor %vm1734_vm4, %vm1735_vm3 }
 0xbf2   : > { %v1730_v56 = vmul.f32 %v2044_v52, %v1729_v55 }
 0xbf4   : > { %v1731_v59 = vmul.f32 0.5, %v1730_v56 }
 0xbf6   : > { %v1732_v54 = vsub.f32 1.5, %v1731_v59 }
 0xbf8   : > { %v1733_v60 = vmul.f32 %v2044_v52, %v1732_v54 }
 0xbfa   : > { %v1737_v48 = vsel %vm1736_vm5, %v2044_v52, %v1733_v60 }
 0xbfb   : > { %v1748_v63 = vmul.f32 %v1737_v48, %v1714_v30 }
 0xbfd   : > { %v1753_v2 = vmul.f32 %v2001_v45, %v1748_v63 }
 0xbff   : > { %v1758_v3 = vadd.f32 %v2002_v62, %v1753_v2 }
 0xc01   : > { %1760 = vst.msk [vmem:[#allocation4] sm:$0xff] %vm762_vm8, %v1758_v3 }
 0xc13   : > { %v1639_v5 = vpop.f32.mrf.mxu3 }
 0xc14   : > { %v1640_v6 = vadd.f32 %v2447_v4, %v1639_v5 }
 0xc16   : > { %v1645_v7 = vmul.f32 0.044715, %v1640_v6  ;;  %v1643_v0 = vmul.f32 0.5, %v1640_v6 }
 0xc18   : > { %v1647_v1 = vmul.f32 %v1645_v7, %v1640_v6 }
 0xc1a   : > { %v1649_v8 = vmul.f32 %v1647_v1, %v1640_v6 }
 0xc1c   : > { %v1651_v9 = vadd.f32 %v1649_v8, %v1640_v6 }
 0xc1e   : > { %v1653_v11 = vmul.f32 0.7978846, %v1651_v9 }
 0xc20   : > { %2045 = vtanh.f32 %v1653_v11 }
 0xc26   : > { %v2046_v53 = vpop.eup %2045 }
 0xc27   : > { %v1657_v12 = vadd.f32 1.0, %v2046_v53 }
 0xc29   : > { %v1659_v13 = vmul.f32 %v1657_v12, %v1643_v0 }
 0xc2b   : > { %1954 = vmatmul.msk.f32.gmra.mxu0 %vm1672_vm15, %v1659_v13 }
 0xca8   : > { %v1699_v14 = vpop.f32.mrf.mxu0 }
 0xca9   : > { %v1700_v15 = vadd.f32 %v2461_v39, %v1699_v14 }
 0xcab   : > { %v1703_v16 = vadd.f32 %v1700_v15, %v1604_v47 }
 0xcad   : > { %v1709_v10 = vsel %vm762_vm8, %v1703_v16, 0.0 }
 0xcae   : > { %1710 = vadd.xlane.f32.xlu1 %v1709_v10 }
 0xd21   : > { %v1711_v4 = vpop.xlane.xlu1 %1710 }
 0xd22   : > { %v1713_v17 = vmul.f32 %v1711_v4, %v2404_v20 }
 0xd24   : > { %v1715_v18 = vsub.f32 %v1703_v16, %v1713_v17 }
 0xd26   : > { %v1717_v19 = vmul.f32 %v1715_v18, %v1715_v18 }
 0xd28   : > { %v1721_v21 = vsel %vm762_vm8, %v1717_v19, 0.0 }
 0xd29   : > { %1722 = vadd.xlane.f32.xlu2 %v1721_v21 }
 0xd9c   : > { %v1723_v57 = vpop.xlane.xlu2 %1722 }
 0xd9d   : > { %v1725_v22 = vmul.f32 %v1723_v57, %v2404_v20 }
 0xd9f   : > { %v1727_v23 = vadd.f32 1e-12, %v1725_v22 }
 0xda1   : > { %2047 = vrsqrt.f32 %v1727_v23  ;;  %vm1744_vm7 = vweird.f32 %v1727_v23 }
 0xda7   : > { %v2048_v24 = vpop.eup %2047 }
 0xda8   : > { %v1739_v25 = vmul.f32 %v2048_v24, %v1727_v23  ;;  %vm1745_vm6 = vweird.f32 %v2048_v24 }
 0xda9   : > { %vm1746_vm9 = vmor %vm1744_vm7, %vm1745_vm6 }
 0xdaa   : > { %v1740_v39 = vmul.f32 %v2048_v24, %v1739_v25 }
 0xdac   : > { %v1741_v61 = vmul.f32 0.5, %v1740_v39 }
 0xdae   : > { %v1742_v58 = vsub.f32 1.5, %v1741_v61 }
 0xdb0   : > { %v1743_v26 = vmul.f32 %v2048_v24, %v1742_v58 }
 0xdb2   : > { %v1747_v27 = vsel %vm1746_vm9, %v2048_v24, %v1743_v26 }
 0xdb3   : > { %v1749_v28 = vmul.f32 %v1747_v27, %v1715_v18 }
 0xdb5   : > { %v1754_v29 = vmul.f32 %v2001_v45, %v1749_v28  ;;  %1765 = sbr.rel (%p1955_p5) target bundleno = 3516 (0xdbc), region = 92 }
 0xdb7   : > { %v1759_v30 = vadd.f32 %v2002_v62, %v1754_v29 }
 0xdb9   : > { %1761 = vst.msk [vmem:[#allocation4 + $0x8] sm:$0xff] %vm762_vm8, %v1759_v30 }
 0xdba   : > { %1766 = vst.msk [vmem:[%s2544_s28] sm:$0xff] %vm762_vm8, %v1758_v3 }
 0xdbb   : > { %1767 = vst.msk [vmem:[%s2544_s28 + $0x8] sm:$0xff] %vm762_vm8, %v1759_v30 }
 0xdbc PF: > { %s2545_s24 = sld [smem:[#allocation5_spill]] }
 0xdc2   : > { %s26_s21 = sadd.s32 1, %s2545_s24  }
 0xdc3   : > { %p23_p6 = scmp.ge.s32.totalorder %s26_s21, 4  }
 0xdc5   :  { %25 = sbr.rel (!%p23_p6) target bundleno = 7 (0x7), region = 151 }

</bundles_post_ra>
